<compile_context>
chip_gen: v5e
topology: v5e:2x2
jax: 0.10.0
libtpu: 0.0.40
codegen_flags: <defaults>
</compile_context>

<pallas_src>
import functools

import jax
import jax.numpy as jnp
import numpy as np
from jax import lax
from jax.experimental import pallas as pl
from jax.experimental.pallas import tpu as pltpu

BN_EPS = 1e-5
_INV_SQRT2 = 0.7071067811865475


def _gelu_exact(x):
    # PyTorch nn.GELU() default (approximate='none'): 0.5*x*(1+erf(x/sqrt(2)))
    return 0.5 * x * (1.0 + lax.erf(x * _INV_SQRT2))


def fc_block_kernel(x_ref, w_ref, g_ref, beta_ref, o_ref, *scratch,
                    inv_batch, use_stash, sublane_partials):
    """grid = (feature_tile j, phase p, row_tile i).
    phase 0: matmul (+ stash z) + accumulate shifted per-feature statistics;
             last row tile converts them to a folded (scale, shift).
    phase 1: y = z*scale + shift, out = GELU(y)."""
    if use_stash:
        psum_ref, psq_ref, off_ref, scale_ref, shift_ref, stash_ref = scratch
    else:
        psum_ref, psq_ref, off_ref, scale_ref, shift_ref = scratch
        stash_ref = None

    phase = pl.program_id(1)
    tile = pl.program_id(2)
    last_tile = pl.num_programs(2) - 1

    def linear():
        # The Linear bias is intentionally omitted: BN's mean subtraction
        # cancels any per-feature constant exactly (variance unchanged).
        return jnp.dot(x_ref[...], w_ref[...],
                       preferred_element_type=jnp.float32)

    def accumulate_stats(z):
        @pl.when(tile == 0)
        def _():
            off_ref[...] = z[0:1, :]          # shift for numerically-safe var
            psum_ref[...] = jnp.zeros_like(psum_ref)
            psq_ref[...] = jnp.zeros_like(psq_ref)

        zc = z - off_ref[...]
        if sublane_partials:
            # Keep per-sublane partial sums; collapse the 8 sublanes only once
            # at the last tile (avoids a cross-sublane reduction per tile).
            zg = zc.reshape(zc.shape[0] // 8, 8, zc.shape[1])
            psum_ref[...] += jnp.sum(zg, axis=0)
            psq_ref[...] += jnp.sum(zg * zg, axis=0)
        else:
            psum_ref[...] += jnp.sum(zc, axis=0, keepdims=True)
            psq_ref[...] += jnp.sum(zc * zc, axis=0, keepdims=True)

        @pl.when(tile == last_tile)
        def _():
            if sublane_partials:
                s = jnp.sum(psum_ref[...], axis=0, keepdims=True)
                sq = jnp.sum(psq_ref[...], axis=0, keepdims=True)
            else:
                s = psum_ref[...]
                sq = psq_ref[...]
            mean_c = s * inv_batch                                  # E[z - off]
            var = jnp.maximum(sq * inv_batch - mean_c * mean_c, 0.0)
            inv_std = lax.rsqrt(var + BN_EPS)
            scale = g_ref[...] * inv_std                            # folded affine
            scale_ref[...] = scale
            shift_ref[...] = beta_ref[...] - (off_ref[...] + mean_c) * scale

    def apply_bn_gelu(z):
        y = z * scale_ref[...] + shift_ref[...]
        o_ref[...] = _gelu_exact(y).astype(o_ref.dtype)

    if use_stash:
        @pl.when(phase == 0)
        def _():
            z = linear()
            stash_ref[tile] = z               # keep z on-chip for phase 1
            accumulate_stats(z)

        @pl.when(phase == 1)
        def _():
            apply_bn_gelu(stash_ref[tile])
    else:
        # Recompute fallback (z too large for VMEM): one matmul per phase.
        z = linear()

        @pl.when(phase == 0)
        def _():
            accumulate_stats(z)

        @pl.when(phase == 1)
        def _():
            apply_bn_gelu(z)


def _physical_vmem_bytes():
    try:
        return int(pltpu.get_tpu_info().vmem_capacity_bytes)
    except Exception:
        return 64 * 1024 * 1024   # conservative (v7x-sized) default


def _vmem_need(tm, tn, k, batch, use_stash):
    x_bufs = 2 if use_stash else 3            # Buffered(3) in the fallback
    return (x_bufs * 4 * tm * k               # x tile
            + 2 * 4 * tm * tn                 # out tile (double buffered)
            + 2 * 4 * k * tn                  # weight tile (conservatively 2x)
            + (4 * batch * tn if use_stash else 0)   # stashed z
            + 8 * 4 * 8 * tn)                 # stats / scale / shift scratch


def _plan(batch, k, n, vmem_bytes):
    """Pick (row_tile, col_tile, use_stash) under a VMEM budget."""
    budget = int(0.55 * vmem_bytes)

    # Feature (lane) tile: keep the full weight resident when small, otherwise
    # tile N in lane-dense multiples of 128 (matters on v7x's 64 MiB VMEM).
    tn = n
    if n % 128 == 0:
        for cand in (n, 4096, 2048, 1024, 512, 256, 128):
            if cand <= n and n % cand == 0 and 8 * k * cand <= budget // 3:
                tn = cand
                break

    # Stash z = x @ W^T on-chip when it fits (halves FLOPs and x HBM reads).
    use_stash = 4 * batch * tn <= budget // 2

    # Row tile: largest divisor of the batch that keeps everything in budget.
    tm = batch   # fallback: single full-extent block (fine for small batches)
    for cand in (2048, 1024, 512, 256, 128, 64, 32, 16, 8):
        if cand <= batch and batch % cand == 0 and \
                _vmem_need(cand, tn, k, batch, use_stash) <= budget:
            tm = cand
            break
    return tm, tn, use_stash


def fc_block(x, params, *, row_tile=None, col_tile=None, use_stash=None):
    """GELU(BatchNorm1d(Linear(x))) with training-mode batch statistics.

    x: (B, in_feats) f32.  params use torch layouts:
       w: (out_feats, in_feats); b, g, beta: (out_feats,).
    Note: params["b"] is not used by the kernel -- BN's mean subtraction
    cancels the Linear bias exactly, leaving the forward output unchanged.
    """
    B, K = x.shape
    N = params["w"].shape[0]

    phys_vmem = _physical_vmem_bytes()
    tm, tn, stash = _plan(B, K, N, phys_vmem)
    if row_tile is not None:
        tm = row_tile
    if col_tile is not None:
        tn = col_tile
    if use_stash is not None:
        stash = use_stash
    if B % tm or N % tn:
        raise ValueError("row_tile / col_tile must divide the array dims")
    if tm != B and tm % 8:
        raise ValueError("row_tile must be a multiple of 8 (or the full batch)")

    T = B // tm
    J = N // tn
    sublane_partials = (tm % 8 == 0)
    stat_rows = 8 if sublane_partials else 1

    w = jnp.transpose(params["w"]).astype(jnp.float32)   # (K, N); lane axis = features
    row_vec = lambda v: v.reshape(1, N).astype(jnp.float32)

    kernel = functools.partial(fc_block_kernel, inv_batch=1.0 / B,
                               use_stash=stash, sublane_partials=sublane_partials)

    last_row_block = T - 1
    if stash:
        # Phase 1 reads the stashed z, never x: keep the last phase-0 x block
        # resident so no x DMA is issued during phase 1.
        x_spec = pl.BlockSpec(
            (tm, K), lambda j, p, i: ((1 - p) * i + p * last_row_block, 0))
    else:
        # Recompute fallback: x streamed in both phases; deepen the x pipeline
        # to hide DMA issue latency behind the small per-tile matmul.
        x_spec = pl.BlockSpec((tm, K), lambda j, p, i: (i, 0),
                              pipeline_mode=pl.Buffered(3))

    scratch = [pltpu.VMEM((stat_rows, tn), jnp.float32),   # partial sum   (shifted)
               pltpu.VMEM((stat_rows, tn), jnp.float32),   # partial sumsq (shifted)
               pltpu.VMEM((1, tn), jnp.float32),           # shift offset (row 0 of z)
               pltpu.VMEM((1, tn), jnp.float32),           # folded scale = g * inv_std
               pltpu.VMEM((1, tn), jnp.float32)]           # folded shift = beta - mean*scale
    if stash:
        scratch.append(pltpu.VMEM((T, tm, tn), jnp.float32))   # stashed z tiles

    grid_spec = pltpu.PrefetchScalarGridSpec(
        num_scalar_prefetch=0,
        grid=(J, 2, T),                                    # (feature tile, phase, row tile)
        in_specs=[
            x_spec,
            pl.BlockSpec((K, tn), lambda j, p, i: (0, j)), # weight tile (resident per j)
            pl.BlockSpec((1, tn), lambda j, p, i: (0, j)), # gamma
            pl.BlockSpec((1, tn), lambda j, p, i: (0, j)), # beta
        ],
        # Phase 0 never writes the output.  Mapping every phase-0 step to row
        # block 0 keeps that block resident (index unchanged => no writeback);
        # phase-1 step 0 overwrites it before the first index change, so only
        # real phase-1 tiles are ever DMA'd back to HBM.
        out_specs=pl.BlockSpec((tm, tn), lambda j, p, i: (p * i, j)),
        scratch_shapes=scratch,
    )

    est = _vmem_need(tm, tn, K, B, stash)
    vmem_limit = int(min(0.75 * phys_vmem, max(32 * 1024 * 1024, 2 * est)))
    matmul_passes = 1 if stash else 2
    flops = matmul_passes * 2 * B * K * N
    bytes_accessed = 4 * (B * K * (J if stash else 2 * J) + K * N + 2 * N + B * N)

    return pl.pallas_call(
        kernel,
        out_shape=jax.ShapeDtypeStruct((B, N), jnp.float32),
        grid_spec=grid_spec,
        compiler_params=pltpu.CompilerParams(
            # Feature tiles are fully independent (own stats, own output
            # columns) -> "parallel" lets v7x's two TensorCores split them.
            # Phase / row-tile axes share the stats scratch -> sequential.
            # (A row-split across cores with a CMEM stats combine would also
            #  engage both v7x cores when J == 1; not implemented here.)
            dimension_semantics=("parallel", "arbitrary", "arbitrary"),
            vmem_limit_bytes=vmem_limit,
        ),
        cost_estimate=pl.CostEstimate(flops=flops, transcendentals=B * N,
                                      bytes_accessed=bytes_accessed),
    )(x.astype(jnp.float32), w, row_vec(params["g"]), row_vec(params["beta"]))


def reference(x, p):
    """Pure-JAX replica of the PyTorch forward (training-mode BatchNorm1d)."""
    z = jnp.dot(x, p["w"].T, precision=lax.Precision.HIGHEST) + p["b"]
    mean = jnp.mean(z, axis=0, keepdims=True)
    var = jnp.mean(jnp.square(z - mean), axis=0, keepdims=True)
    zh = (z - mean) * lax.rsqrt(var + BN_EPS)
    zh = zh * p["g"] + p["beta"]
    return 0.5 * zh * (1.0 + lax.erf(zh * _INV_SQRT2))


if __name__ == "__main__":
    key = jax.random.PRNGKey(0)
    B, IN_FEATS, OUT_FEATS = 256, 64, 128   # lane-dense feature dim

    ks = jax.random.split(key, 5)
    x = jax.random.normal(ks[0], (B, IN_FEATS), jnp.float32)
    params = {
        "w": 0.1 * jax.random.normal(ks[1], (OUT_FEATS, IN_FEATS), jnp.float32),
        "b": 0.05 * jax.random.normal(ks[2], (OUT_FEATS,), jnp.float32),
        "g": 1.0 + 0.1 * jax.random.normal(ks[3], (OUT_FEATS,), jnp.float32),
        "beta": 0.05 * jax.random.normal(ks[4], (OUT_FEATS,), jnp.float32),
    }

    ref = jax.block_until_ready(reference(x, params))

    # 1) Auto plan (single resident row tile + stashed z at this shape).
    out = jax.block_until_ready(fc_block(x, params))
    np.testing.assert_allclose(np.asarray(out), np.asarray(ref),
                               rtol=1e-4, atol=1e-4)

    # 2) Forced multi-tile streaming path (stash, 4 row tiles).
    out_tiled = jax.block_until_ready(fc_block(x, params, row_tile=64))
    np.testing.assert_allclose(np.asarray(out_tiled), np.asarray(ref),
                               rtol=1e-4, atol=1e-4)

    # 3) Forced recompute fallback (no stash, deeper x pipeline).
    out_recomp = jax.block_until_ready(
        fc_block(x, params, row_tile=64, use_stash=False))
    np.testing.assert_allclose(np.asarray(out_recomp), np.asarray(ref),
                               rtol=1e-4, atol=1e-4)

    print("KERNEL_OK")
</pallas_src>

<mosaic_0001>
module attributes {stable_mosaic.version = 11 : i64} {
  func.func @fc_block_kernel(%arg0: i32, %arg1: i32, %arg2: i32, %arg3: memref<256x64xf32, #tpu.memory_space<vmem>>, %arg4: memref<64x128xf32, #tpu.memory_space<vmem>>, %arg5: memref<1x128xf32, #tpu.memory_space<vmem>>, %arg6: memref<1x128xf32, #tpu.memory_space<vmem>>, %arg7: memref<256x128xf32, #tpu.memory_space<vmem>>, %arg8: memref<8x128xf32, #tpu.memory_space<vmem>>, %arg9: memref<8x128xf32, #tpu.memory_space<vmem>>, %arg10: memref<1x128xf32, #tpu.memory_space<vmem>>, %arg11: memref<1x128xf32, #tpu.memory_space<vmem>>, %arg12: memref<1x128xf32, #tpu.memory_space<vmem>>, %arg13: memref<1x256x128xf32, #tpu.memory_space<vmem>>) attributes {dimension_semantics = [#tpu.dimension_semantics<parallel>, #tpu.dimension_semantics<arbitrary>, #tpu.dimension_semantics<arbitrary>], iteration_bounds = array<i64: 1, 2, 1>, scalar_prefetch = 0 : i64, scratch_operands = 6 : i64, tpu.core_type = #tpu.core_type<tc>, window_params = [{transform_indices = @transform_0, window_bounds = array<i64: 256, 64>}, {transform_indices = @transform_1, window_bounds = array<i64: 64, 128>}, {transform_indices = @transform_2, window_bounds = array<i64: 1, 128>}, {transform_indices = @transform_3, window_bounds = array<i64: 1, 128>}, {transform_indices = @transform_4, window_bounds = array<i64: 256, 128>}]} {
    %c0_i32 = arith.constant 0 : i32
    %0 = arith.cmpi eq, %arg1, %c0_i32 : i32
    %1 = arith.extui %0 : i1 to i32
    %c0_i32_0 = arith.constant 0 : i32
    %2 = arith.cmpi ne, %1, %c0_i32_0 : i32
    scf.if %2 {
      %c0 = arith.constant 0 : index
      %c0_2 = arith.constant 0 : index
      %6 = vector.load %arg3[%c0, %c0_2] : memref<256x64xf32, #tpu.memory_space<vmem>>, vector<256x64xf32>
      %c0_3 = arith.constant 0 : index
      %c0_4 = arith.constant 0 : index
      %7 = vector.load %arg4[%c0_3, %c0_4] : memref<64x128xf32, #tpu.memory_space<vmem>>, vector<64x128xf32>
      %cst = arith.constant dense<0.000000e+00> : vector<256x128xf32>
      %8 = tpu.matmul %6, %7, %cst {dimension_numbers = #tpu.dot_dimension_numbers<[1], [0], [0], [1], [0, 0, 1, 1], [], []>} : vector<256x64xf32>, vector<64x128xf32>, vector<256x128xf32> -> vector<256x128xf32>
      %9 = arith.index_cast %arg2 : i32 to index
      %c0_5 = arith.constant 0 : index
      %c0_6 = arith.constant 0 : index
      %10 = vector.load %arg13[%9, %c0_5, %c0_6] : memref<1x256x128xf32, #tpu.memory_space<vmem>>, vector<1x256x128xf32>
      %11 = vector.shape_cast %10 : vector<1x256x128xf32> to vector<256x128xf32>
      %12 = vector.shape_cast %8 : vector<256x128xf32> to vector<1x256x128xf32>
      tpu.vector_store %arg13[%9, %c0_5, %c0_6], %12 {strides = array<i32>} : memref<1x256x128xf32, #tpu.memory_space<vmem>>, vector<1x256x128xf32>,
      %c0_i32_7 = arith.constant 0 : i32
      %13 = arith.cmpi eq, %arg2, %c0_i32_7 : i32
      %14 = arith.extui %13 : i1 to i32
      %c0_i32_8 = arith.constant 0 : i32
      %15 = arith.cmpi ne, %14, %c0_i32_8 : i32
      scf.if %15 {
        %32 = vector.extract_strided_slice %8 {offsets = [0, 0], sizes = [1, 128], strides = [1, 1]} : vector<256x128xf32> to vector<1x128xf32>
        %c0_23 = arith.constant 0 : index
        %c0_24 = arith.constant 0 : index
        %33 = vector.load %arg10[%c0_23, %c0_24] : memref<1x128xf32, #tpu.memory_space<vmem>>, vector<1x128xf32>
        tpu.vector_store %arg10[%c0_23, %c0_24], %32 {strides = array<i32>} : memref<1x128xf32, #tpu.memory_space<vmem>>, vector<1x128xf32>,
        %cst_25 = arith.constant 0.000000e+00 : f32
        %34 = vector.broadcast %cst_25 : f32 to vector<8x128xf32>
        %c0_26 = arith.constant 0 : index
        %c0_27 = arith.constant 0 : index
        %35 = vector.load %arg8[%c0_26, %c0_27] : memref<8x128xf32, #tpu.memory_space<vmem>>, vector<8x128xf32>
        tpu.vector_store %arg8[%c0_26, %c0_27], %34 {strides = array<i32>} : memref<8x128xf32, #tpu.memory_space<vmem>>, vector<8x128xf32>,
        %cst_28 = arith.constant 0.000000e+00 : f32
        %36 = vector.broadcast %cst_28 : f32 to vector<8x128xf32>
        %c0_29 = arith.constant 0 : index
        %c0_30 = arith.constant 0 : index
        %37 = vector.load %arg9[%c0_29, %c0_30] : memref<8x128xf32, #tpu.memory_space<vmem>>, vector<8x128xf32>
        tpu.vector_store %arg9[%c0_29, %c0_30], %36 {strides = array<i32>} : memref<8x128xf32, #tpu.memory_space<vmem>>, vector<8x128xf32>,
      } else {
      }
      %c0_9 = arith.constant 0 : index
      %c0_10 = arith.constant 0 : index
      %16 = vector.load %arg10[%c0_9, %c0_10] : memref<1x128xf32, #tpu.memory_space<vmem>>, vector<1x128xf32>
      %17 = vector.broadcast %16 : vector<1x128xf32> to vector<256x128xf32>
      %18 = arith.subf %8, %17 : vector<256x128xf32>
      %19 = vector.shape_cast %18 : vector<256x128xf32> to vector<32x8x128xf32>
      %c0_11 = arith.constant 0 : index
      %c0_12 = arith.constant 0 : index
      %20 = vector.load %arg8[%c0_11, %c0_12] : memref<8x128xf32, #tpu.memory_space<vmem>>, vector<8x128xf32>
      %cst_13 = arith.constant dense<0.000000e+00> : vector<8x128xf32>
      %21 = vector.multi_reduction <add>, %19, %cst_13 [0] : vector<32x8x128xf32> to vector<8x128xf32>
      %22 = arith.addf %20, %21 : vector<8x128xf32>
      %c0_14 = arith.constant 0 : index
      %c0_15 = arith.constant 0 : index
      %23 = vector.load %arg8[%c0_14, %c0_15] : memref<8x128xf32, #tpu.memory_space<vmem>>, vector<8x128xf32>
      tpu.vector_store %arg8[%c0_14, %c0_15], %22 {strides = array<i32>} : memref<8x128xf32, #tpu.memory_space<vmem>>, vector<8x128xf32>,
      %c0_16 = arith.constant 0 : index
      %c0_17 = arith.constant 0 : index
      %24 = vector.load %arg9[%c0_16, %c0_17] : memref<8x128xf32, #tpu.memory_space<vmem>>, vector<8x128xf32>
      %25 = arith.mulf %19, %19 : vector<32x8x128xf32>
      %cst_18 = arith.constant dense<0.000000e+00> : vector<8x128xf32>
      %26 = vector.multi_reduction <add>, %25, %cst_18 [0] : vector<32x8x128xf32> to vector<8x128xf32>
      %27 = arith.addf %24, %26 : vector<8x128xf32>
      %c0_19 = arith.constant 0 : index
      %c0_20 = arith.constant 0 : index
      %28 = vector.load %arg9[%c0_19, %c0_20] : memref<8x128xf32, #tpu.memory_space<vmem>>, vector<8x128xf32>
      tpu.vector_store %arg9[%c0_19, %c0_20], %27 {strides = array<i32>} : memref<8x128xf32, #tpu.memory_space<vmem>>, vector<8x128xf32>,
      %c0_i32_21 = arith.constant 0 : i32
      %29 = arith.cmpi eq, %arg2, %c0_i32_21 : i32
      %30 = arith.extui %29 : i1 to i32
      %c0_i32_22 = arith.constant 0 : i32
      %31 = arith.cmpi ne, %30, %c0_i32_22 : i32
      scf.if %31 {
        %c0_23 = arith.constant 0 : index
        %c0_24 = arith.constant 0 : index
        %32 = vector.load %arg8[%c0_23, %c0_24] : memref<8x128xf32, #tpu.memory_space<vmem>>, vector<8x128xf32>
        %cst_25 = arith.constant dense<0.000000e+00> : vector<128xf32>
        %33 = vector.multi_reduction <add>, %32, %cst_25 [0] : vector<8x128xf32> to vector<128xf32>
        %34 = vector.shape_cast %33 : vector<128xf32> to vector<1x128xf32>
        %c0_26 = arith.constant 0 : index
        %c0_27 = arith.constant 0 : index
        %35 = vector.load %arg9[%c0_26, %c0_27] : memref<8x128xf32, #tpu.memory_space<vmem>>, vector<8x128xf32>
        %cst_28 = arith.constant dense<0.000000e+00> : vector<128xf32>
        %36 = vector.multi_reduction <add>, %35, %cst_28 [0] : vector<8x128xf32> to vector<128xf32>
        %37 = vector.shape_cast %36 : vector<128xf32> to vector<1x128xf32>
        %cst_29 = arith.constant 3.906250e-03 : f32
        %38 = vector.broadcast %cst_29 : f32 to vector<1x128xf32>
        %39 = arith.mulf %34, %38 : vector<1x128xf32>
        %cst_30 = arith.constant 3.906250e-03 : f32
        %40 = vector.broadcast %cst_30 : f32 to vector<1x128xf32>
        %41 = arith.mulf %37, %40 : vector<1x128xf32>
        %42 = arith.mulf %39, %39 : vector<1x128xf32>
        %43 = arith.subf %41, %42 : vector<1x128xf32>
        %cst_31 = arith.constant 0.000000e+00 : f32
        %44 = vector.broadcast %cst_31 : f32 to vector<1x128xf32>
        %45 = arith.maximumf %43, %44 : vector<1x128xf32>
        %cst_32 = arith.constant 9.99999974E-6 : f32
        %46 = vector.broadcast %cst_32 : f32 to vector<1x128xf32>
        %47 = arith.addf %45, %46 : vector<1x128xf32>
        %48 = math.rsqrt %47 : vector<1x128xf32>
        %c0_33 = arith.constant 0 : index
        %c0_34 = arith.constant 0 : index
        %49 = vector.load %arg5[%c0_33, %c0_34] : memref<1x128xf32, #tpu.memory_space<vmem>>, vector<1x128xf32>
        %50 = arith.mulf %49, %48 : vector<1x128xf32>
        %c0_35 = arith.constant 0 : index
        %c0_36 = arith.constant 0 : index
        %51 = vector.load %arg11[%c0_35, %c0_36] : memref<1x128xf32, #tpu.memory_space<vmem>>, vector<1x128xf32>
        tpu.vector_store %arg11[%c0_35, %c0_36], %50 {strides = array<i32>} : memref<1x128xf32, #tpu.memory_space<vmem>>, vector<1x128xf32>,
        %c0_37 = arith.constant 0 : index
        %c0_38 = arith.constant 0 : index
        %52 = vector.load %arg6[%c0_37, %c0_38] : memref<1x128xf32, #tpu.memory_space<vmem>>, vector<1x128xf32>
        %c0_39 = arith.constant 0 : index
        %c0_40 = arith.constant 0 : index
        %53 = vector.load %arg10[%c0_39, %c0_40] : memref<1x128xf32, #tpu.memory_space<vmem>>, vector<1x128xf32>
        %54 = arith.addf %53, %39 : vector<1x128xf32>
        %55 = arith.mulf %54, %50 : vector<1x128xf32>
        %56 = arith.subf %52, %55 : vector<1x128xf32>
        %c0_41 = arith.constant 0 : index
        %c0_42 = arith.constant 0 : index
        %57 = vector.load %arg12[%c0_41, %c0_42] : memref<1x128xf32, #tpu.memory_space<vmem>>, vector<1x128xf32>
        tpu.vector_store %arg12[%c0_41, %c0_42], %56 {strides = array<i32>} : memref<1x128xf32, #tpu.memory_space<vmem>>, vector<1x128xf32>,
      } else {
      }
    } else {
    }
    %c1_i32 = arith.constant 1 : i32
    %3 = arith.cmpi eq, %arg1, %c1_i32 : i32
    %4 = arith.extui %3 : i1 to i32
    %c0_i32_1 = arith.constant 0 : i32
    %5 = arith.cmpi ne, %4, %c0_i32_1 : i32
    scf.if %5 {
      %6 = arith.index_cast %arg2 : i32 to index
      %c0 = arith.constant 0 : index
      %c0_2 = arith.constant 0 : index
      %7 = vector.load %arg13[%6, %c0, %c0_2] : memref<1x256x128xf32, #tpu.memory_space<vmem>>, vector<1x256x128xf32>
      %8 = vector.shape_cast %7 : vector<1x256x128xf32> to vector<256x128xf32>
      %c0_3 = arith.constant 0 : index
      %c0_4 = arith.constant 0 : index
      %9 = vector.load %arg11[%c0_3, %c0_4] : memref<1x128xf32, #tpu.memory_space<vmem>>, vector<1x128xf32>
      %10 = vector.broadcast %9 : vector<1x128xf32> to vector<256x128xf32>
      %11 = arith.mulf %8, %10 : vector<256x128xf32>
      %c0_5 = arith.constant 0 : index
      %c0_6 = arith.constant 0 : index
      %12 = vector.load %arg12[%c0_5, %c0_6] : memref<1x128xf32, #tpu.memory_space<vmem>>, vector<1x128xf32>
      %13 = vector.broadcast %12 : vector<1x128xf32> to vector<256x128xf32>
      %14 = arith.addf %11, %13 : vector<256x128xf32>
      %cst = arith.constant 5.000000e-01 : f32
      %15 = vector.broadcast %cst : f32 to vector<256x128xf32>
      %16 = arith.mulf %15, %14 : vector<256x128xf32>
      %cst_7 = arith.constant 0.707106769 : f32
      %17 = vector.broadcast %cst_7 : f32 to vector<256x128xf32>
      %18 = arith.mulf %14, %17 : vector<256x128xf32>
      %19 = math.erf %18 : vector<256x128xf32>
      %cst_8 = arith.constant 1.000000e+00 : f32
      %20 = vector.broadcast %cst_8 : f32 to vector<256x128xf32>
      %21 = arith.addf %20, %19 : vector<256x128xf32>
      %22 = arith.mulf %16, %21 : vector<256x128xf32>
      %c0_9 = arith.constant 0 : index
      %c0_10 = arith.constant 0 : index
      %23 = vector.load %arg7[%c0_9, %c0_10] : memref<256x128xf32, #tpu.memory_space<vmem>>, vector<256x128xf32>
      tpu.vector_store %arg7[%c0_9, %c0_10], %22 {strides = array<i32>} : memref<256x128xf32, #tpu.memory_space<vmem>>, vector<256x128xf32>,
    } else {
    }
    return
  }
  func.func @transform_0(%arg0: i32, %arg1: i32, %arg2: i32) -> (i32, i32) {
    %c1_i32 = arith.constant 1 : i32
    %0 = arith.subi %c1_i32, %arg1 : i32
    %1 = arith.muli %0, %arg2 : i32
    %c0_i32 = arith.constant 0 : i32
    %2 = arith.muli %arg1, %c0_i32 : i32
    %3 = arith.addi %1, %2 : i32
    %c0_i32_0 = arith.constant 0 : i32
    %c0_i32_1 = arith.constant 0 : i32
    return %3, %c0_i32_0 : i32, i32
  }
  func.func @transform_1(%arg0: i32, %arg1: i32, %arg2: i32) -> (i32, i32) {
    %c0_i32 = arith.constant 0 : i32
    %c0_i32_0 = arith.constant 0 : i32
    return %c0_i32, %arg0 : i32, i32
  }
  func.func @transform_2(%arg0: i32, %arg1: i32, %arg2: i32) -> (i32, i32) {
    %c0_i32 = arith.constant 0 : i32
    %c0_i32_0 = arith.constant 0 : i32
    return %c0_i32, %arg0 : i32, i32
  }
  func.func @transform_3(%arg0: i32, %arg1: i32, %arg2: i32) -> (i32, i32) {
    %c0_i32 = arith.constant 0 : i32
    %c0_i32_0 = arith.constant 0 : i32
    return %c0_i32, %arg0 : i32, i32
  }
  func.func @transform_4(%arg0: i32, %arg1: i32, %arg2: i32) -> (i32, i32) {
    %0 = arith.muli %arg1, %arg2 : i32
    %c0_i32 = arith.constant 0 : i32
    return %0, %arg0 : i32, i32
  }
}

</mosaic_0001>

<bundles_post_ra>
// kernel: tpu_custom_call.1
= control target key start
LH: loop header
LB: loop body
LE: loop exit
PB: predicated region body
PF: predicated region fallthrough
CT: control target
= control target key end

     0   :  { %9 = vsyncpa [#allocation9], 0  ;;  %s4357_s0 = inlined_call_operand.vmem [shape: f32[256,64], index: 0, kind: input, shape index: {}]   ;;  %s4358_s1 = inlined_call_operand.vmem [shape: f32[64,128], index: 1, kind: input, shape index: {}]   ;;  %s4359_s2 = inlined_call_operand.vmem [shape: f32[1,128], index: 2, kind: input, shape index: {}]   ;;  %s4360_s3 = inlined_call_operand.vmem [shape: f32[1,128], index: 3, kind: input, shape index: {}]   ;;  %s4361_s4 = inlined_call_operand.hbm [shape: f32[256,128], index: 4, kind: output, shape index: {}]  }
   0x1   :  { %11 = vsyncpa [#allocation9 + $0x1], 0  ;;  %s2739_s15 = smov 0   ;;  %s2741_s16 = smov 0  }
   0x2   :  { %s2743_s17 = smov 0  }
   0x3 LB: > { %s2441_s18 = sadd.s32 4294967295, %s2709_s17   ;;  %s2442_s19 = sadd.s32 4294967294, %s2709_s17   ;;  %s2709_s17 = sphi %s2743_s17, %s17_s17   ;;  %s2705_s16 = sphi %s2741_s16, %s4465_s16   ;;  %s2701_s15 = sphi %s2739_s15, %s4464_s15  }
   0x4   : > { %s32_s20 = sadd.s32 1, %s2705_s16  ;;  %p2449_p0 = scmp.ge.s32.totalorder %s2709_s17, 1 }
   0x5   : > { %p34_p1 = scmp.ge.s32.totalorder %s32_s20, 2  ;;  %p222_p2 = scmp.lt.s32.totalorder %s2709_s17, 3 }
   0x7   : > { %s4467_s20 = smov (%p34_p1, %s32_s20), 0  ;;  %p223_p3 = pnand %p2449_p0, %p222_p2 }
   0x8   : > { %p2450_p4 = scmp.ne.s32.totalorder (!%p223_p3), %s2701_s15, 0 }
   0x9   : > { %226 = sbr.rel (%p223_p3) target bundleno = 702 (0x2be), region = 36 }
   0xe   : > { %285 = sbr.rel (%p2450_p4) target bundleno = 317 (0x13d), region = 40 }
  0x13   : > { %v325_v0 = vld [vmem:[%s4358_s1 + $0x38] sm:$0xff]  ;;  %v324_v1 = vld [vmem:[%s4358_s1 + $0x30] sm:$0xff]  ;;  %v323_v2 = vld [vmem:[%s4358_s1 + $0x28] sm:$0xff]  ;;  %vm326_vm0 = vcmask 523264  }
  0x14   : > { %431 = vmatpush.msra.mxu0 %v325_v0  ;;  %2520 = vmatpush.msra.mxu1 %v325_v0  ;;  %v322_v3 = vld [vmem:[%s4358_s1 + $0x20] sm:$0xff]  ;;  %v321_v4 = vld [vmem:[%s4358_s1 + $0x18] sm:$0xff]  ;;  %v320_v5 = vld [vmem:[%s4358_s1 + $0x10] sm:$0xff] }
  0x15   : > { %2521 = vmatpush.msra.mxu2 %v325_v0  ;;  %2522 = vmatpush.msra.mxu3 %v325_v0  ;;  %v319_v6 = vld [vmem:[%s4358_s1 + $0x8] sm:$0xff]  ;;  %v318_v7 = vld [vmem:[%s4358_s1] sm:$0xff]  ;;  %v288_v16 = vld [vmem:[%s4357_s0 + $0x10] sm:$0xff] }
  0x16   : > { %432 = vmatpush.msra.mxu0 %v324_v1  ;;  %2523 = vmatpush.msra.mxu1 %v324_v1  ;;  %v286_v8 = vld [vmem:[%s4357_s0] sm:$0xff]  ;;  %v287_v12 = vld [vmem:[%s4357_s0 + $0x8] sm:$0xff]  ;;  %v296_v17 = vld [vmem:[%s4357_s0 + $0x50] sm:$0xff] }
  0x17   : > { %2524 = vmatpush.msra.mxu2 %v324_v1  ;;  %2525 = vmatpush.msra.mxu3 %v324_v1  ;;  %v294_v9 = vld [vmem:[%s4357_s0 + $0x40] sm:$0xff]  ;;  %v295_v13 = vld [vmem:[%s4357_s0 + $0x48] sm:$0xff]  ;;  %v304_v18 = vld [vmem:[%s4357_s0 + $0x90] sm:$0xff] }
  0x18   : > { %433 = vmatpush.msra.mxu0 %v323_v2  ;;  %2526 = vmatpush.msra.mxu1 %v323_v2  ;;  %v302_v10 = vld [vmem:[%s4357_s0 + $0x80] sm:$0xff]  ;;  %v303_v14 = vld [vmem:[%s4357_s0 + $0x88] sm:$0xff]  ;;  %v312_v19 = vld [vmem:[%s4357_s0 + $0xd0] sm:$0xff] }
  0x19   : > { %2527 = vmatpush.msra.mxu2 %v323_v2  ;;  %2528 = vmatpush.msra.mxu3 %v323_v2  ;;  %v310_v11 = vld [vmem:[%s4357_s0 + $0xc0] sm:$0xff]  ;;  %v311_v15 = vld [vmem:[%s4357_s0 + $0xc8] sm:$0xff]  ;;  %v289_v20 = vld [vmem:[%s4357_s0 + $0x18] sm:$0xff] }
  0x1a   : > { %434 = vmatpush.msra.mxu0 %v322_v3  ;;  %2529 = vmatpush.msra.mxu1 %v322_v3  ;;  %v297_v21 = vld [vmem:[%s4357_s0 + $0x58] sm:$0xff]  ;;  %v290_v24 = vld [vmem:[%s4357_s0 + $0x20] sm:$0xff]  ;;  %v291_v28 = vld [vmem:[%s4357_s0 + $0x28] sm:$0xff] }
  0x1b   : > { %2530 = vmatpush.msra.mxu2 %v322_v3  ;;  %2531 = vmatpush.msra.mxu3 %v322_v3  ;;  %v305_v22 = vld [vmem:[%s4357_s0 + $0x98] sm:$0xff]  ;;  %v298_v25 = vld [vmem:[%s4357_s0 + $0x60] sm:$0xff]  ;;  %v299_v29 = vld [vmem:[%s4357_s0 + $0x68] sm:$0xff] }
  0x1c   : > { %435 = vmatpush.msra.mxu0 %v321_v4  ;;  %2532 = vmatpush.msra.mxu1 %v321_v4  ;;  %v313_v23 = vld [vmem:[%s4357_s0 + $0xd8] sm:$0xff]  ;;  %v306_v26 = vld [vmem:[%s4357_s0 + $0xa0] sm:$0xff]  ;;  %v307_v30 = vld [vmem:[%s4357_s0 + $0xa8] sm:$0xff] }
  0x1d   : > { %2533 = vmatpush.msra.mxu2 %v321_v4  ;;  %2534 = vmatpush.msra.mxu3 %v321_v4  ;;  %v314_v27 = vld [vmem:[%s4357_s0 + $0xe0] sm:$0xff]  ;;  %v315_v31 = vld [vmem:[%s4357_s0 + $0xe8] sm:$0xff]  ;;  %v292_v32 = vld [vmem:[%s4357_s0 + $0x30] sm:$0xff] }
  0x1e   : > { %436 = vmatpush.msra.mxu0 %v320_v5  ;;  %2535 = vmatpush.msra.mxu1 %v320_v5  ;;  %v300_v33 = vld [vmem:[%s4357_s0 + $0x70] sm:$0xff]  ;;  %v293_v36 = vld [vmem:[%s4357_s0 + $0x38] sm:$0xff] }
  0x1f   : > { %2536 = vmatpush.msra.mxu2 %v320_v5  ;;  %2537 = vmatpush.msra.mxu3 %v320_v5  ;;  %v308_v34 = vld [vmem:[%s4357_s0 + $0xb0] sm:$0xff]  ;;  %v301_v37 = vld [vmem:[%s4357_s0 + $0x78] sm:$0xff] }
  0x20   : > { %437 = vmatpush.msra.mxu0 %v319_v6  ;;  %2538 = vmatpush.msra.mxu1 %v319_v6  ;;  %v316_v35 = vld [vmem:[%s4357_s0 + $0xf0] sm:$0xff]  ;;  %v309_v38 = vld [vmem:[%s4357_s0 + $0xb8] sm:$0xff] }
  0x21   : > { %2539 = vmatpush.msra.mxu2 %v319_v6  ;;  %2540 = vmatpush.msra.mxu3 %v319_v6  ;;  %v317_v39 = vld [vmem:[%s4357_s0 + $0xf8] sm:$0xff] }
  0x22   : > { %438 = vmatpush.msra.mxu0 %v318_v7  ;;  %2541 = vmatpush.msra.mxu1 %v318_v7 }
  0x23   : > { %2542 = vmatpush.msra.mxu2 %v318_v7  ;;  %2543 = vmatpush.msra.mxu3 %v318_v7 }
  0x24   : > { %2451 = vmatmul.msk.f32.vlgmr.msra.gmra.mxu0 %vm326_vm0, %v286_v8  ;;  %2459 = vmatmul.msk.f32.vlgmr.msra.gmra.mxu1 %vm326_vm0, %v294_v9 }
  0x25   : > { %2467 = vmatmul.msk.f32.vlgmr.msra.gmra.mxu2 %vm326_vm0, %v302_v10  ;;  %2475 = vmatmul.msk.f32.vlgmr.msra.gmra.mxu3 %vm326_vm0, %v310_v11 }
  0x2c   : > { %2452 = vmatmul.msk.f32.gmra.mxu0 %vm326_vm0, %v287_v12  ;;  %2460 = vmatmul.msk.f32.gmra.mxu1 %vm326_vm0, %v295_v13 }
  0x2d   : > { %2468 = vmatmul.msk.f32.gmra.mxu2 %vm326_vm0, %v303_v14  ;;  %2476 = vmatmul.msk.f32.gmra.mxu3 %vm326_vm0, %v311_v15 }
  0x34   : > { %2453 = vmatmul.msk.f32.gmra.mxu0 %vm326_vm0, %v288_v16  ;;  %2461 = vmatmul.msk.f32.gmra.mxu1 %vm326_vm0, %v296_v17 }
  0x35   : > { %2469 = vmatmul.msk.f32.gmra.mxu2 %vm326_vm0, %v304_v18  ;;  %2477 = vmatmul.msk.f32.gmra.mxu3 %vm326_vm0, %v312_v19 }
  0x3c   : > { %2454 = vmatmul.msk.f32.gmra.mxu0 %vm326_vm0, %v289_v20  ;;  %2462 = vmatmul.msk.f32.gmra.mxu1 %vm326_vm0, %v297_v21 }
  0x3d   : > { %2470 = vmatmul.msk.f32.gmra.mxu2 %vm326_vm0, %v305_v22  ;;  %2478 = vmatmul.msk.f32.gmra.mxu3 %vm326_vm0, %v313_v23 }
  0x44   : > { %2455 = vmatmul.msk.f32.gmra.mxu0 %vm326_vm0, %v290_v24  ;;  %2463 = vmatmul.msk.f32.gmra.mxu1 %vm326_vm0, %v298_v25 }
  0x45   : > { %2471 = vmatmul.msk.f32.gmra.mxu2 %vm326_vm0, %v306_v26  ;;  %2479 = vmatmul.msk.f32.gmra.mxu3 %vm326_vm0, %v314_v27 }
  0x4c   : > { %2456 = vmatmul.msk.f32.gmra.mxu0 %vm326_vm0, %v291_v28  ;;  %2464 = vmatmul.msk.f32.gmra.mxu1 %vm326_vm0, %v299_v29 }
  0x4d   : > { %2472 = vmatmul.msk.f32.gmra.mxu2 %vm326_vm0, %v307_v30  ;;  %2480 = vmatmul.msk.f32.gmra.mxu3 %vm326_vm0, %v315_v31 }
  0x54   : > { %2457 = vmatmul.msk.f32.gmra.mxu0 %vm326_vm0, %v292_v32  ;;  %2465 = vmatmul.msk.f32.gmra.mxu1 %vm326_vm0, %v300_v33 }
  0x55   : > { %2473 = vmatmul.msk.f32.gmra.mxu2 %vm326_vm0, %v308_v34  ;;  %2481 = vmatmul.msk.f32.gmra.mxu3 %vm326_vm0, %v316_v35 }
  0x5c   : > { %2458 = vmatmul.msk.f32.gmra.mxu0 %vm326_vm0, %v293_v36  ;;  %2466 = vmatmul.msk.f32.gmra.mxu1 %vm326_vm0, %v301_v37 }
  0x5d   : > { %2474 = vmatmul.msk.f32.gmra.mxu2 %vm326_vm0, %v309_v38  ;;  %2482 = vmatmul.msk.f32.gmra.mxu3 %vm326_vm0, %v317_v39 }
  0xa1   : > { %v440_v40 = vpop.f32.mrf.mxu0  ;;  %v2914_v41 = vpop.f32.mrf.mxu1 }
  0xa2   : > { %538 = vst [vmem:[#allocation7 + $0xb0] sm:$0xff] %v440_v40 }
  0xa3   : > { %574 = vst [vmem:[#allocation4] sm:$0x1] %v440_v40 }
  0xa4   : > { %546 = vst [vmem:[#allocation7 + $0x80] sm:$0xff] %v2914_v41 }
  0xa8   : > { %v2917_v42 = vpop.f32.mrf.mxu2  ;;  %v2919_v43 = vpop.f32.mrf.mxu3 }
  0xa9   : > { %554 = vst [vmem:[#allocation7 + $0x38] sm:$0xff] %v2917_v42  ;;  %v443_v44 = vpop.f32.mrf.mxu0  ;;  %v2922_v45 = vpop.f32.mrf.mxu1 }
  0xaa   : > { %562 = vst [vmem:[#allocation7 + $0xa8] sm:$0xff] %v2919_v43  ;;  %v2953_v58 = vld [vmem:[#allocation4] ss:$0 sm:$0xff] }
  0xab   : > { %539 = vst [vmem:[#allocation7] sm:$0xff] %v443_v44  ;;  %v581_v63 = vsub.f32 %v440_v40, %v2953_v58  ;;  %v582_v0 = vsub.f32 %v443_v44, %v2953_v58  ;;  %v589_v29 = vsub.f32 %v2914_v41, %v2953_v58  ;;  %v590_v34 = vsub.f32 %v2922_v45, %v2953_v58 }
  0xac   : > { %547 = vst [vmem:[#allocation7 + $0x88] sm:$0xff] %v2922_v45 }
  0xad   : > { %v648_v2 = vmul.f32 %v581_v63, %v581_v63  ;;  %v649_v3 = vmul.f32 %v582_v0, %v582_v0  ;;  %v614_v5 = vadd.f32 %v582_v0, %v581_v63  ;;  %v656_v38 = vmul.f32 %v589_v29, %v589_v29 }
  0xae   : > { %v657_v44 = vmul.f32 %v590_v34, %v590_v34 }
  0xaf   : > { %v680_v12 = vadd.f32 %v649_v3, %v648_v2 }
  0xb0   : > { %v2926_v46 = vpop.f32.mrf.mxu2  ;;  %v2928_v47 = vpop.f32.mrf.mxu3 }
  0xb1   : > { %555 = vst [vmem:[#allocation7 + $0x58] sm:$0xff] %v2926_v46  ;;  %v446_v48 = vpop.f32.mrf.mxu0  ;;  %v2931_v49 = vpop.f32.mrf.mxu1 }
  0xb2   : > { %563 = vst [vmem:[#allocation7 + $0xd0] sm:$0xff] %v2928_v47  ;;  %v583_v1 = vsub.f32 %v446_v48, %v2953_v58  ;;  %v591_v39 = vsub.f32 %v2931_v49, %v2953_v58 }
  0xb3   : > { %540 = vst [vmem:[#allocation7 + $0xd8] sm:$0xff] %v446_v48 }
  0xb4   : > { %548 = vst [vmem:[#allocation7 + $0xe8] sm:$0xff] %v2931_v49  ;;  %v650_v6 = vmul.f32 %v583_v1, %v583_v1  ;;  %v615_v13 = vadd.f32 %v614_v5, %v583_v1  ;;  %v658_v45 = vmul.f32 %v591_v39, %v591_v39 }
  0xb6   : > { %v681_v16 = vadd.f32 %v680_v12, %v650_v6 }
  0xb8   : > { %v2935_v50 = vpop.f32.mrf.mxu2  ;;  %v2937_v51 = vpop.f32.mrf.mxu3 }
  0xb9   : > { %556 = vst [vmem:[#allocation7 + $0x40] sm:$0xff] %v2935_v50  ;;  %v449_v52 = vpop.f32.mrf.mxu0  ;;  %v2940_v53 = vpop.f32.mrf.mxu1 }
  0xba   : > { %564 = vst [vmem:[#allocation7 + $0x10] sm:$0xff] %v2937_v51  ;;  %v584_v4 = vsub.f32 %v449_v52, %v2953_v58  ;;  %v592_v48 = vsub.f32 %v2940_v53, %v2953_v58 }
  0xbb   : > { %541 = vst [vmem:[#allocation7 + $0x18] sm:$0xff] %v449_v52 }
  0xbc   : > { %549 = vst [vmem:[#allocation7 + $0xb8] sm:$0xff] %v2940_v53  ;;  %v651_v14 = vmul.f32 %v584_v4, %v584_v4  ;;  %v616_v17 = vadd.f32 %v615_v13, %v584_v4  ;;  %v659_v49 = vmul.f32 %v592_v48, %v592_v48 }
  0xbe   : > { %v682_v20 = vadd.f32 %v681_v16, %v651_v14 }
  0xc0   : > { %v2944_v54 = vpop.f32.mrf.mxu2  ;;  %v2946_v55 = vpop.f32.mrf.mxu3 }
  0xc1   : > { %557 = vst [vmem:[#allocation7 + $0xc8] sm:$0xff] %v2944_v54  ;;  %v452_v56 = vpop.f32.mrf.mxu0  ;;  %v2949_v57 = vpop.f32.mrf.mxu1 }
  0xc2   : > { %565 = vst [vmem:[#allocation7 + $0x28] sm:$0xff] %v2946_v55  ;;  %v585_v7 = vsub.f32 %v452_v56, %v2953_v58  ;;  %v593_v0 = vsub.f32 %v2949_v57, %v2953_v58 }
  0xc3   : > { %542 = vst [vmem:[#allocation7 + $0x50] sm:$0xff] %v452_v56 }
  0xc4   : > { %550 = vst [vmem:[#allocation7 + $0x60] sm:$0xff] %v2949_v57  ;;  %v652_v18 = vmul.f32 %v585_v7, %v585_v7  ;;  %v617_v21 = vadd.f32 %v616_v17, %v585_v7  ;;  %v660_v5 = vmul.f32 %v593_v0, %v593_v0 }
  0xc6   : > { %v683_v23 = vadd.f32 %v682_v20, %v652_v18 }
  0xc8   : > { %v2955_v59 = vpop.f32.mrf.mxu2  ;;  %v2957_v60 = vpop.f32.mrf.mxu3 }
  0xc9   : > { %558 = vst [vmem:[#allocation7 + $0xe0] sm:$0xff] %v2955_v59  ;;  %v455_v61 = vpop.f32.mrf.mxu0  ;;  %v2960_v62 = vpop.f32.mrf.mxu1 }
  0xca   : > { %566 = vst [vmem:[#allocation7 + $0xa0] sm:$0xff] %v2957_v60  ;;  %v586_v15 = vsub.f32 %v455_v61, %v2953_v58  ;;  %v594_v3 = vsub.f32 %v2960_v62, %v2953_v58 }
  0xcb   : > { %543 = vst [vmem:[#allocation7 + $0x68] sm:$0xff] %v455_v61 }
  0xcc   : > { %551 = vst [vmem:[#allocation7 + $0xf0] sm:$0xff] %v2960_v62  ;;  %v653_v22 = vmul.f32 %v586_v15, %v586_v15  ;;  %v618_v24 = vadd.f32 %v617_v21, %v586_v15  ;;  %v661_v12 = vmul.f32 %v594_v3, %v594_v3  ;;  %v597_v15 = vsub.f32 %v2917_v42, %v2953_v58 }
  0xcd   : > { %v598_v62 = vsub.f32 %v2926_v46, %v2953_v58 }
  0xce   : > { %v684_v30 = vadd.f32 %v683_v23, %v653_v22  ;;  %v599_v22 = vsub.f32 %v2935_v50, %v2953_v58 }
  0xd0   : > { %v2969_v8 = vpop.f32.mrf.mxu2  ;;  %v2971_v9 = vpop.f32.mrf.mxu3 }
  0xd1   : > { %559 = vst [vmem:[#allocation7 + $0x90] sm:$0xff] %v2969_v8  ;;  %v458_v10 = vpop.f32.mrf.mxu0  ;;  %v482_v11 = vpop.f32.mrf.mxu1 }
  0xd2   : > { %567 = vst [vmem:[#allocation7 + $0xf8] sm:$0xff] %v2971_v9  ;;  %v587_v19 = vsub.f32 %v458_v10, %v2953_v58  ;;  %v595_v6 = vsub.f32 %v482_v11, %v2953_v58 }
  0xd3   : > { %544 = vst [vmem:[#allocation7 + $0x30] sm:$0xff] %v458_v10 }
  0xd4   : > { %552 = vst [vmem:[#allocation7 + $0x8] sm:$0xff] %v482_v11  ;;  %v654_v25 = vmul.f32 %v587_v19, %v587_v19  ;;  %v619_v31 = vadd.f32 %v618_v24, %v587_v19  ;;  %v662_v16 = vmul.f32 %v595_v6, %v595_v6  ;;  %v664_v11 = vmul.f32 %v597_v15, %v597_v15 }
  0xd6   : > { %v685_v35 = vadd.f32 %v684_v30, %v654_v25  ;;  %v665_v25 = vmul.f32 %v598_v62, %v598_v62  ;;  %v666_v30 = vmul.f32 %v599_v22, %v599_v22 }
  0xd8   : > { %v2977_v26 = vpop.f32.mrf.mxu2  ;;  %v2979_v27 = vpop.f32.mrf.mxu3 }
  0xd9   : > { %560 = vst [vmem:[#allocation7 + $0x70] sm:$0xff] %v2977_v26  ;;  %v461_v28 = vpop.f32.mrf.mxu0  ;;  %v485_v33 = vpop.f32.mrf.mxu1 }
  0xda   : > { %568 = vst [vmem:[#allocation7 + $0x20] sm:$0xff] %v2979_v27  ;;  %v588_v32 = vsub.f32 %v461_v28, %v2953_v58  ;;  %v596_v13 = vsub.f32 %v485_v33, %v2953_v58 }
  0xdb   : > { %545 = vst [vmem:[#allocation7 + $0x48] sm:$0xff] %v461_v28  ;;  %v600_v28 = vsub.f32 %v2944_v54, %v2953_v58 }
  0xdc   : > { %v620_v36 = vadd.f32 %v619_v31, %v588_v32  ;;  %v655_v37 = vmul.f32 %v588_v32, %v588_v32  ;;  %553 = vst [vmem:[#allocation7 + $0x78] sm:$0xff] %v485_v33  ;;  %v663_v20 = vmul.f32 %v596_v13, %v596_v13  ;;  %v601_v31 = vsub.f32 %v2955_v59, %v2953_v58 }
  0xdd   : > { %v667_v33 = vmul.f32 %v600_v28, %v600_v28  ;;  %v605_v59 = vsub.f32 %v2919_v43, %v2953_v58 }
  0xde   : > { %v621_v40 = vadd.f32 %v620_v36, %v589_v29  ;;  %v686_v41 = vadd.f32 %v685_v35, %v655_v37  ;;  %v668_v36 = vmul.f32 %v601_v31, %v601_v31  ;;  %v603_v37 = vsub.f32 %v2977_v26, %v2953_v58 }
  0xdf   : > { %v672_v26 = vmul.f32 %v605_v59, %v605_v59 }
  0xe0   : > { %v622_v52 = vadd.f32 %v621_v40, %v590_v34  ;;  %v687_v56 = vadd.f32 %v686_v41, %v656_v38  ;;  %v509_v61 = vpop.f32.mrf.mxu2  ;;  %v2992_v63 = vpop.f32.mrf.mxu3  ;;  %v602_v34 = vsub.f32 %v2969_v8, %v2953_v58  ;;  %v606_v8 = vsub.f32 %v2928_v47, %v2953_v58 }
  0xe1   : > { %561 = vst [vmem:[#allocation7 + $0xc0] sm:$0xff] %v509_v61  ;;  %v604_v40 = vsub.f32 %v509_v61, %v2953_v58 }
  0xe2   : > { %v623_v1 = vadd.f32 %v622_v52, %v591_v39  ;;  %v688_v2 = vadd.f32 %v687_v56, %v657_v44  ;;  %569 = vst [vmem:[#allocation7 + $0x98] sm:$0xff] %v2992_v63  ;;  %v669_v39 = vmul.f32 %v602_v34, %v602_v34 }
  0xe4   : > { %v689_v4 = vadd.f32 %v688_v2, %v658_v45  ;;  %v624_v53 = vadd.f32 %v623_v1, %v592_v48  ;;  %v670_v48 = vmul.f32 %v603_v37, %v603_v37  ;;  %v607_v2 = vsub.f32 %v2937_v51, %v2953_v58 }
  0xe6   : > { %v625_v7 = vadd.f32 %v624_v53, %v593_v0  ;;  %v690_v10 = vadd.f32 %v689_v4, %v659_v49  ;;  %v671_v0 = vmul.f32 %v604_v40, %v604_v40  ;;  %v608_v4 = vsub.f32 %v2946_v55, %v2953_v58 }
  0xe8   : > { %v626_v14 = vadd.f32 %v625_v7, %v594_v3  ;;  %v691_v57 = vadd.f32 %v690_v10, %v660_v5  ;;  %v673_v3 = vmul.f32 %v606_v8, %v606_v8  ;;  %v674_v5 = vmul.f32 %v607_v2, %v607_v2 }
  0xe9   : > { %v675_v10 = vmul.f32 %v608_v4, %v608_v4 }
  0xea   : > { %v627_v17 = vadd.f32 %v626_v14, %v595_v6  ;;  %v692_v18 = vadd.f32 %v691_v57, %v661_v12  ;;  %v609_v6 = vsub.f32 %v2957_v60, %v2953_v58  ;;  %v610_v12 = vsub.f32 %v2971_v9, %v2953_v58 }
  0xeb   : > { %v611_v57 = vsub.f32 %v2979_v27, %v2953_v58 }
  0xec   : > { %v628_v19 = vadd.f32 %v627_v17, %v596_v13  ;;  %v693_v21 = vadd.f32 %v692_v18, %v662_v16  ;;  %v676_v14 = vmul.f32 %v609_v6, %v609_v6  ;;  %v677_v16 = vmul.f32 %v610_v12, %v610_v12 }
  0xed   : > { %v612_v17 = vsub.f32 %v2992_v63, %v2953_v58 }
  0xee   : > { %v629_v23 = vadd.f32 %v628_v19, %v597_v15  ;;  %v694_v24 = vadd.f32 %v693_v21, %v663_v20 }
  0xf0   : > { %v630_v42 = vadd.f32 %v629_v23, %v598_v62  ;;  %v695_v29 = vadd.f32 %v694_v24, %v664_v11  ;;  %v678_v62 = vmul.f32 %v611_v57, %v611_v57  ;;  %v679_v11 = vmul.f32 %v612_v17, %v612_v17 }
  0xf2   : > { %v631_v46 = vadd.f32 %v630_v42, %v599_v22  ;;  %v696_v32 = vadd.f32 %v695_v29, %v665_v25 }
  0xf4   : > { %v697_v35 = vadd.f32 %v696_v32, %v666_v30  ;;  %v632_v50 = vadd.f32 %v631_v46, %v600_v28 }
  0xf6   : > { %v633_v38 = vadd.f32 %v632_v50, %v601_v31  ;;  %v698_v54 = vadd.f32 %v697_v35, %v667_v33 }
  0xf8   : > { %v634_v41 = vadd.f32 %v633_v38, %v602_v34  ;;  %v699_v44 = vadd.f32 %v698_v54, %v668_v36 }
  0xfa   : > { %v635_v52 = vadd.f32 %v634_v41, %v603_v37  ;;  %v700_v56 = vadd.f32 %v699_v44, %v669_v39  ;;  %v746_v44 = vld [vmem:[%s4359_s2] sm:$0x1] }
  0xfc   : > { %v636_v45 = vadd.f32 %v635_v52, %v604_v40  ;;  %v701_v1 = vadd.f32 %v700_v56, %v670_v48  ;;  %v750_v48 = vld [vmem:[#allocation4] sm:$0x1] }
  0xfe   : > { %v637_v49 = vadd.f32 %v636_v45, %v605_v59  ;;  %v702_v61 = vadd.f32 %v701_v1, %v671_v0 }
 0x100   : > { %v638_v43 = vadd.f32 %v637_v49, %v606_v8  ;;  %v703_v53 = vadd.f32 %v702_v61, %v672_v26  ;;  %v749_v8 = vld [vmem:[%s4360_s3] sm:$0x1] }
 0x102   : > { %v639_v47 = vadd.f32 %v638_v43, %v607_v2  ;;  %v704_v7 = vadd.f32 %v703_v53, %v673_v3 }
 0x104   : > { %v705_v13 = vadd.f32 %v704_v7, %v674_v5  ;;  %v640_v51 = vadd.f32 %v639_v47, %v608_v4 }
 0x106   : > { %v641_v15 = vadd.f32 %v640_v51, %v609_v6  ;;  %v706_v55 = vadd.f32 %v705_v13, %v675_v10 }
 0x108   : > { %v642_v18 = vadd.f32 %v641_v15, %v610_v12  ;;  %v707_v60 = vadd.f32 %v706_v55, %v676_v14 }
 0x10a   : > { %v643_v19 = vadd.f32 %v642_v18, %v611_v57  ;;  %v708_v20 = vadd.f32 %v707_v60, %v677_v16 }
 0x10c   : > { %v644_v21 = vadd.f32 %v643_v19, %v612_v17  ;;  %v709_v9 = vadd.f32 %v708_v20, %v678_v62 }
 0x10e   : > { %v710_v22 = vadd.f32 %v709_v9, %v679_v11  ;;  %v717_v23 = vrot.slane %v644_v21, 4 }
 0x110   : > { %v718_v24 = vadd.f32 %v717_v23, %v644_v21  ;;  %v724_v25 = vrot.slane %v710_v22, 4 }
 0x112   : > { %v719_v28 = vrot.slane %v718_v24, 2  ;;  %v725_v27 = vadd.f32 %v724_v25, %v710_v22 }
 0x114   : > { %v720_v42 = vadd.f32 %v719_v28, %v718_v24  ;;  %v726_v29 = vrot.slane %v725_v27, 2 }
 0x116   : > { %v721_v30 = vrot.slane %v720_v42, 1  ;;  %v727_v31 = vadd.f32 %v726_v29, %v725_v27 }
 0x118   : > { %v722_v46 = vadd.f32 %v721_v30, %v720_v42  ;;  %v728_v58 = vrot.slane %v727_v31, 1 }
 0x11a   : > { %v729_v63 = vadd.f32 %v728_v58, %v727_v31  ;;  %v730_v32 = vmul.f32 0.00390625, %v722_v46 }
 0x11c   : > { %v731_v33 = vmul.f32 0.00390625, %v729_v63  ;;  %v732_v34 = vmul.f32 %v730_v32, %v730_v32  ;;  %v751_v56 = vadd.f32 %v750_v48, %v730_v32 }
 0x11e   : > { %v733_v35 = vsub.f32 %v731_v33, %v732_v34 }
 0x120   : > { %v734_v50 = vmax.f32 %v733_v35, 0.0 }
 0x122   : > { %v735_v36 = vadd.f32 1e-05, %v734_v50 }
 0x124   : > { %2583 = vrsqrt.f32 %v735_v36  ;;  %vm742_vm2 = vweird.f32 %v735_v36 }
 0x12a   : > { %v2584_v37 = vpop.eup %2583 }
 0x12b   : > { %v737_v38 = vmul.f32 %v2584_v37, %v735_v36  ;;  %vm743_vm1 = vweird.f32 %v2584_v37 }
 0x12c   : > { %vm744_vm3 = vmor %vm742_vm2, %vm743_vm1 }
 0x12d   : > { %v738_v54 = vmul.f32 %v2584_v37, %v737_v38 }
 0x12f   : > { %v739_v39 = vmul.f32 0.5, %v738_v54 }
 0x131   : > { %v740_v40 = vsub.f32 1.5, %v739_v39 }
 0x133   : > { %v741_v41 = vmul.f32 %v2584_v37, %v740_v40 }
 0x135   : > { %v745_v59 = vsel %vm744_vm3, %v2584_v37, %v741_v41 }
 0x136   : > { %v747_v52 = vmul.f32 %v746_v44, %v745_v59 }
 0x138   : > { %748 = vst [vmem:[#allocation5] sm:$0x1] %v747_v52  ;;  %v752_v45 = vmul.f32 %v751_v56, %v747_v52 }
 0x13a   : > { %v753_v0 = vsub.f32 %v749_v8, %v752_v45 }
 0x13c   : > { %754 = vst [vmem:[#allocation6] sm:$0x1] %v753_v0 }
 0x13d PF: > { %p2483_p5 = scmp.ne.s32.totalorder %s2701_s15, 1 }
 0x13f   : > { %758 = sbr.rel (%p2483_p5) target bundleno = 698 (0x2ba), region = 52 }
 0x144   : > { %v761_v1 = vld [vmem:[#allocation7 + $0xb0] sm:$0xff]  ;;  %v3039_v26 = vld [vmem:[#allocation5] ss:$0 sm:$0xff]  ;;  %v3041_v2 = vld [vmem:[#allocation6] ss:$0 sm:$0xff] }
 0x145   : > { %v762_v49 = vld [vmem:[#allocation7] sm:$0xff]  ;;  %v797_v61 = vmul.f32 %v3039_v26, %v761_v1  ;;  %v763_v4 = vld [vmem:[#allocation7 + $0xd8] sm:$0xff]  ;;  %v765_v53 = vld [vmem:[#allocation7 + $0x50] sm:$0xff] }
 0x146   : > { %v798_v3 = vmul.f32 %v3039_v26, %v762_v49  ;;  %v764_v43 = vld [vmem:[#allocation7 + $0x18] sm:$0xff]  ;;  %v799_v5 = vmul.f32 %v3039_v26, %v763_v4  ;;  %v801_v47 = vmul.f32 %v3039_v26, %v765_v53  ;;  %v766_v57 = vld [vmem:[#allocation7 + $0x68] sm:$0xff]  ;;  %v767_v1 = vld [vmem:[#allocation7 + $0x30] sm:$0xff] }
 0x147   : > { %v800_v6 = vmul.f32 %v3039_v26, %v764_v43  ;;  %v833_v7 = vadd.f32 %v3041_v2, %v797_v61  ;;  %v802_v19 = vmul.f32 %v3039_v26, %v766_v57 }
 0x148   : > { %v3050_v10 = vadd.f32 %v3041_v2, %v798_v3  ;;  %v3053_v12 = vadd.f32 %v3041_v2, %v799_v5  ;;  %v3070_v16 = vadd.f32 %v3041_v2, %v801_v47 }
 0x149   : > { %v3056_v13 = vadd.f32 %v3041_v2, %v800_v6  ;;  %v3058_v51 = vmul.f32 0.70710677, %v833_v7  ;;  %v3085_v11 = vmul.f32 0.5, %v833_v7  ;;  %v3101_v30 = vadd.f32 %v3041_v2, %v802_v19 }
 0x14a   : > { %v3061_v14 = vmul.f32 0.70710677, %v3050_v10  ;;  %v3064_v15 = vmul.f32 0.70710677, %v3053_v12  ;;  %v3092_v23 = vmul.f32 0.70710677, %v3070_v16 }
 0x14b   : > { %v3067_v55 = vmul.f32 0.70710677, %v3056_v13  ;;  %v929_v17 = vmul.f32 %v3058_v51, %v3058_v51  ;;  %v3111_v39 = vmul.f32 0.70710677, %v3101_v30 }
 0x14c   : > { %v969_v18 = vmul.f32 %v3061_v14, %v3061_v14  ;;  %v1009_v60 = vmul.f32 %v3064_v15, %v3064_v15  ;;  %v1089_v57 = vmul.f32 %v3092_v23, %v3092_v23 }
 0x14d   : > { %v1049_v62 = vmul.f32 %v3067_v55, %v3067_v55  ;;  %v3081_v20 = vmin.f32 %v929_v17, 16.0  ;;  %v803_v17 = vmul.f32 %v3039_v26, %v767_v1 }
 0x14e   : > { %v3083_v21 = vmin.f32 %v969_v18, 16.0  ;;  %v3087_v9 = vmin.f32 %v1009_v60, 16.0 }
 0x14f   : > { %v3089_v22 = vmin.f32 %v1049_v62, 16.0  ;;  %v931_v24 = vmul.f32 2.1237322e-06, %v3081_v20  ;;  %v942_v25 = vmul.f32 3.8918573e-05, %v3081_v20 }
 0x150   : > { %v971_v28 = vmul.f32 2.1237322e-06, %v3083_v21  ;;  %v982_v27 = vmul.f32 3.8918573e-05, %v3083_v21  ;;  %v1011_v42 = vmul.f32 2.1237322e-06, %v3087_v9 }
 0x151   : > { %v1022_v29 = vmul.f32 3.8918573e-05, %v3087_v9  ;;  %v932_v31 = vadd.f32 0.00028619796, %v931_v24  ;;  %v943_v46 = vadd.f32 0.001143296, %v942_v25 }
 0x152   : > { %v972_v58 = vadd.f32 0.00028619796, %v971_v28  ;;  %v983_v63 = vadd.f32 0.001143296, %v982_v27  ;;  %v1012_v32 = vadd.f32 0.00028619796, %v1011_v42 }
 0x153   : > { %v1023_v33 = vadd.f32 0.001143296, %v1022_v29  ;;  %v933_v34 = vmul.f32 %v932_v31, %v3081_v20  ;;  %v944_v35 = vmul.f32 %v943_v46, %v3081_v20  ;;  %v1051_v36 = vmul.f32 2.1237322e-06, %v3089_v22 }
 0x154   : > { %v973_v50 = vmul.f32 %v972_v58, %v3083_v21  ;;  %v984_v37 = vmul.f32 %v983_v63, %v3083_v21  ;;  %v1013_v38 = vmul.f32 %v1012_v32, %v3087_v9  ;;  %v1062_v4 = vmul.f32 3.8918573e-05, %v3089_v22 }
 0x155   : > { %v1024_v54 = vmul.f32 %v1023_v33, %v3087_v9  ;;  %v934_v40 = vadd.f32 0.0036580483, %v933_v34  ;;  %v945_v41 = vadd.f32 0.014752088, %v944_v35  ;;  %v1052_v0 = vadd.f32 0.00028619796, %v1051_v36 }
 0x156   : > { %v974_v44 = vadd.f32 0.0036580483, %v973_v50  ;;  %v985_v59 = vadd.f32 0.014752088, %v984_v37  ;;  %v1014_v48 = vadd.f32 0.0036580483, %v1013_v38  ;;  %v1129_v33 = vmul.f32 %v3111_v39, %v3111_v39 }
 0x157   : > { %v1025_v52 = vadd.f32 0.014752088, %v1024_v54  ;;  %v935_v56 = vmul.f32 %v934_v40, %v3081_v20  ;;  %v946_v8 = vmul.f32 %v945_v41, %v3081_v20  ;;  %v1053_v6 = vmul.f32 %v1052_v0, %v3089_v22 }
 0x158   : > { %v975_v45 = vmul.f32 %v974_v44, %v3083_v21  ;;  %v986_v49 = vmul.f32 %v985_v59, %v3083_v21  ;;  %v1015_v61 = vmul.f32 %v1014_v48, %v3087_v9  ;;  %v1063_v27 = vadd.f32 0.001143296, %v1062_v4 }
 0x159   : > { %v1026_v3 = vmul.f32 %v1025_v52, %v3087_v9  ;;  %v936_v43 = vadd.f32 0.05243302, %v935_v56  ;;  %v947_v53 = vadd.f32 0.112945676, %v946_v8  ;;  %v1054_v28 = vadd.f32 0.0036580483, %v1053_v6 }
 0x15a   : > { %v976_v5 = vadd.f32 0.05243302, %v975_v45  ;;  %v987_v47 = vadd.f32 0.112945676, %v986_v49  ;;  %v1016_v7 = vadd.f32 0.05243302, %v1015_v61  ;;  %v1064_v54 = vmul.f32 %v1063_v27, %v3089_v22 }
 0x15b   : > { %v937_v18 = vmul.f32 %v936_v43, %v3081_v20  ;;  %v948_v60 = vmul.f32 %v947_v53, %v3081_v20  ;;  %v1027_v19 = vadd.f32 0.112945676, %v1026_v3  ;;  %v1055_v32 = vmul.f32 %v1054_v28, %v3089_v22 }
 0x15c   : > { %v977_v62 = vmul.f32 %v976_v5, %v3083_v21  ;;  %v988_v24 = vmul.f32 %v987_v47, %v3083_v21  ;;  %v1017_v25 = vmul.f32 %v1016_v7, %v3087_v9  ;;  %v3138_v40 = vmin.f32 %v1089_v57, 16.0 }
 0x15d   : > { %v938_v42 = vadd.f32 0.18741608, %v937_v18  ;;  %v949_v29 = vadd.f32 0.4994258, %v948_v60  ;;  %v1028_v46 = vmul.f32 %v1027_v19, %v3087_v9  ;;  %v1056_v38 = vadd.f32 0.05243302, %v1055_v32 }
 0x15e   : > { %v978_v31 = vadd.f32 0.18741608, %v977_v62  ;;  %v989_v58 = vadd.f32 0.4994258, %v988_v24  ;;  %v1018_v63 = vadd.f32 0.18741608, %v1017_v25  ;;  %v3142_v48 = vadd.f32 %v3041_v2, %v803_v17 }
 0x15f   : > { %v939_v34 = vmul.f32 %v938_v42, %v3081_v20  ;;  %v950_v35 = vmul.f32 %v949_v29, %v3081_v20  ;;  %v1029_v36 = vadd.f32 0.4994258, %v1028_v46  ;;  %v1057_v56 = vmul.f32 %v1056_v38, %v3089_v22 }
 0x160   : > { %v979_v50 = vmul.f32 %v978_v31, %v3083_v21  ;;  %v990_v37 = vmul.f32 %v989_v58, %v3083_v21  ;;  %v1019_v59 = vmul.f32 %v1018_v63, %v3087_v9  ;;  %v1065_v8 = vadd.f32 0.014752088, %v1064_v54 }
 0x161   : > { %v940_v41 = vadd.f32 1.1283791, %v939_v34  ;;  %v951_v44 = vadd.f32 1.0, %v950_v35  ;;  %v1030_v20 = vmul.f32 %v1029_v36, %v3087_v9  ;;  %v3149_v21 = vmul.f32 0.5, %v3050_v10 }
 0x162   : > { %v3144_v52 = vadd.f32 1.0, %v990_v37  ;;  %v980_v45 = vadd.f32 1.1283791, %v979_v50  ;;  %v3152_v0 = vmul.f32 0.5, %v3053_v12  ;;  %v3155_v61 = vmin.f32 %v1129_v33, 16.0 }
 0x163   : > { %2587 = vrcp.f32 %v951_v44  ;;  %v961_v1 = vand.u32 2147483647, %v951_v44  ;;  %v963_v49 = vand.u32 2147483648, %v951_v44  ;;  %v1020_v4 = vadd.f32 1.1283791, %v1019_v59 }
 0x164   : > { %2589 = vrcp.f32 %v3144_v52  ;;  %v1001_v3 = vand.u32 2147483647, %v3144_v52  ;;  %v1003_v9 = vand.u32 2147483648, %v3144_v52  ;;  %v3160_v43 = vmul.f32 0.5, %v3056_v13 }
 0x165   : > { %v3163_v10 = vmul.f32 %v940_v41, %v3058_v51  ;;  %v3165_v53 = vadd.f32 1.0, %v1030_v20  ;;  %v1058_v12 = vadd.f32 0.18741608, %v1057_v56  ;;  %v1066_v5 = vmul.f32 %v1065_v8, %v3089_v22 }
 0x166   : > { %vm957_vm4 = vweird.f32 %v951_v44  ;;  %v3169_v6 = vmul.f32 %v980_v45, %v3061_v14  ;;  %vm997_vm5 = vweird.f32 %v3144_v52  ;;  %v1091_v47 = vmul.f32 2.1237322e-06, %v3138_v40 }
 0x167   : > { %vm3173_vm6 = vcmp.eq.f32.partialorder %v961_v1, 8.507059e+37  ;;  %v964_v13 = vor.u32 1.1754944e-38, %v963_v49  ;;  %v1004_v51 = vor.u32 1.1754944e-38, %v1003_v9  ;;  %2591 = vrcp.f32 %v3165_v53 }
 0x168   : > { %v1102_v57 = vmul.f32 3.8918573e-05, %v3138_v40  ;;  %vm3179_vm7 = vcmp.eq.f32.partialorder %v1001_v3, 8.507059e+37  ;;  %v3184_v14 = vmul.f32 %v1020_v4, %v3064_v15  ;;  %v1041_v60 = vand.u32 2147483647, %v3165_v53 }
 0x169   : > { %v2588_v17 = vpop.eup %2587  ;;  %v1067_v62 = vadd.f32 0.112945676, %v1066_v5  ;;  %v1092_v19 = vadd.f32 0.00028619796, %v1091_v47  ;;  %vm1037_vm8 = vweird.f32 %v3165_v53  ;;  %v1043_v28 = vand.u32 2147483648, %v3165_v53 }
 0x16a   : > { %v2590_v24 = vpop.eup %2589  ;;  %v953_v25 = vmul.f32 %v2588_v17, %v951_v44  ;;  %v1059_v27 = vmul.f32 %v1058_v12, %v3089_v22  ;;  %vm958_vm9 = vweird.f32 %v2588_v17  ;;  %v3193_v15 = vmul.f32 0.5, %v3070_v16 }
 0x16b   : > { %v993_v42 = vmul.f32 %v2590_v24, %v3144_v52  ;;  %v1068_v29 = vmul.f32 %v1067_v62, %v3089_v22  ;;  %v1093_v46 = vmul.f32 %v1092_v19, %v3138_v40  ;;  %v1103_v58 = vadd.f32 0.001143296, %v1102_v57  ;;  %vm3204_vm12 = vmor %vm957_vm4, %vm958_vm9 }
 0x16c   : > { %v954_v31 = vsub.f32 1.0, %v953_v25  ;;  %v1131_v63 = vmul.f32 2.1237322e-06, %v3155_v61  ;;  %vm998_vm10 = vweird.f32 %v2590_v24  ;;  %vm3197_vm11 = vcmp.eq.f32.partialorder %v1041_v60, 8.507059e+37 }
 0x16d   : > { %v994_v32 = vsub.f32 1.0, %v993_v42  ;;  %v1069_v34 = vadd.f32 0.4994258, %v1068_v29  ;;  %v2592_v35 = vpop.eup %2591  ;;  %v1094_v36 = vadd.f32 0.0036580483, %v1093_v46  ;;  %v1104_v37 = vmul.f32 %v1103_v58, %v3138_v40  ;;  %vm3213_vm13 = vmor %vm997_vm5, %vm998_vm10 }
 0x16e   : > { %v955_v50 = vmul.f32 %v2588_v17, %v954_v31  ;;  %v1132_v16 = vadd.f32 0.00028619796, %v1131_v63  ;;  %v1033_v41 = vmul.f32 %v2592_v35, %v3165_v53  ;;  %v1142_v20 = vmul.f32 3.8918573e-05, %v3155_v61 }
 0x16f   : > { %v995_v54 = vmul.f32 %v2590_v24, %v994_v32  ;;  %v1070_v59 = vmul.f32 %v1069_v34, %v3089_v22  ;;  %v1095_v44 = vmul.f32 %v1094_v36, %v3138_v40  ;;  %v1105_v45 = vadd.f32 0.014752088, %v1104_v37 }
 0x170   : > { %v956_v56 = vadd.f32 %v2588_v17, %v955_v50  ;;  %v1133_v1 = vmul.f32 %v1132_v16, %v3155_v61  ;;  %v1034_v3 = vsub.f32 1.0, %v1033_v41  ;;  %vm1038_vm14 = vweird.f32 %v2592_v35  ;;  %v768_v16 = vld [vmem:[#allocation7 + $0x48] sm:$0xff] }
 0x171   : > { %v996_v49 = vadd.f32 %v2590_v24, %v995_v54  ;;  %v3219_v9 = vadd.f32 1.0, %v1070_v59  ;;  %v1060_v4 = vadd.f32 1.1283791, %v1059_v27  ;;  %v1096_v12 = vadd.f32 0.05243302, %v1095_v44  ;;  %vm3234_vm15 = vmor %vm1037_vm8, %vm1038_vm14 }
 0x172   : > { %v960_v22 = vsel %vm3204_vm12, %v2588_v17, %v956_v56  ;;  %v1106_v52 = vmul.f32 %v1105_v45, %v3138_v40  ;;  %v1035_v57 = vmul.f32 %v2592_v35, %v1034_v3  ;;  %v1044_v19 = vor.u32 1.1754944e-38, %v1043_v28 }
 0x173   : > { %v965_v5 = vsel %vm3173_vm6, %v964_v13, %v960_v22  ;;  %v1000_v47 = vsel %vm3213_vm13, %v2590_v24, %v996_v49  ;;  %2593 = vrcp.f32 %v3219_v9  ;;  %v1134_v7 = vadd.f32 0.0036580483, %v1133_v1  ;;  %v769_v22 = vld [vmem:[#allocation7 + $0x80] sm:$0xff] }
 0x174   : > { %v966_v60 = vmul.f32 %v965_v5, %v3163_v10  ;;  %v1005_v62 = vsel %vm3179_vm7, %v1004_v51, %v1000_v47  ;;  %v1036_v25 = vadd.f32 %v2592_v35, %v1035_v57  ;;  %v1097_v24 = vmul.f32 %v1096_v12, %v3138_v40 }
 0x175   : > { %v1006_v13 = vmul.f32 %v1005_v62, %v3169_v6  ;;  %v1143_v27 = vadd.f32 0.001143296, %v1142_v20  ;;  %v1061_v10 = vmul.f32 %v1060_v4, %v3067_v55  ;;  %vm1077_vm0 = vweird.f32 %v3219_v9 }
 0x176   : > { %v2484_v42 = vclamps-f32 %v966_v60, 1.0  ;;  %v1107_v51 = vadd.f32 0.112945676, %v1106_v52  ;;  %v1040_v53 = vsel %vm3234_vm15, %v2592_v35, %v1036_v25  ;;  %v1081_v29 = vand.u32 2147483647, %v3219_v9 }
 0x177   : > { %v2485_v18 = vclamps-f32 %v1006_v13, 1.0  ;;  %v1098_v28 = vadd.f32 0.18741608, %v1097_v24  ;;  %v1045_v6 = vsel %vm3197_vm11, %v1044_v19, %v1040_v53  ;;  %v1135_v58 = vmul.f32 %v1134_v7, %v3155_v61 }
 0x178   : > { %v2209_v31 = vadd.f32 1.0, %v2484_v42  ;;  %v1108_v46 = vmul.f32 %v1107_v51, %v3138_v40  ;;  %v1046_v32 = vmul.f32 %v1045_v6, %v3184_v14  ;;  %v1144_v50 = vmul.f32 %v1143_v27, %v3155_v61 }
 0x179   : > { %v2594_v63 = vpop.eup %2593  ;;  %v2210_v55 = vadd.f32 1.0, %v2485_v18  ;;  %v1099_v34 = vmul.f32 %v1098_v28, %v3138_v40  ;;  %v1083_v37 = vand.u32 2147483648, %v3219_v9  ;;  %v1136_v41 = vadd.f32 0.05243302, %v1135_v58 }
 0x17a   : > { %v2241_v35 = vmul.f32 %v2209_v31, %v3085_v11  ;;  %v1073_v36 = vmul.f32 %v2594_v63, %v3219_v9  ;;  %v1109_v33 = vadd.f32 0.4994258, %v1108_v46  ;;  %v2486_v54 = vclamps-f32 %v1046_v32, 1.0 }
 0x17b   : > { %v2242_v38 = vmul.f32 %v2210_v55, %v3149_v21  ;;  %vm1078_vm1 = vweird.f32 %v2594_v63  ;;  %v1145_v20 = vadd.f32 0.014752088, %v1144_v50  ;;  %v3258_v56 = vmul.f32 0.70710677, %v3142_v48 }
 0x17c   : > { %2273 = vst [vmem:[#allocation8] sm:$0xff] %v2241_v35  ;;  %v1074_v59 = vsub.f32 1.0, %v1073_v36  ;;  %v1110_v14 = vmul.f32 %v1109_v33, %v3138_v40  ;;  %v2211_v11 = vadd.f32 1.0, %v2486_v54  ;;  %v1100_v8 = vadd.f32 1.1283791, %v1099_v34  ;;  %vm3269_vm2 = vmor %vm1077_vm0, %vm1078_vm1 }
 0x17d   : > { %2274 = vst [vmem:[#allocation8 + $0x8] sm:$0xff] %v2242_v38  ;;  %v1137_v44 = vmul.f32 %v1136_v41, %v3155_v61  ;;  %v804_v45 = vmul.f32 %v3039_v26, %v768_v16  ;;  %v1146_v49 = vmul.f32 %v1145_v20, %v3155_v61  ;;  %v1169_v3 = vmul.f32 %v3258_v56, %v3258_v56  ;;  %v770_v38 = vld [vmem:[#allocation7 + $0x88] sm:$0xff] }
 0x17e   : > { %v1075_v1 = vmul.f32 %v2594_v63, %v1074_v59  ;;  %v1111_v21 = vadd.f32 1.0, %v1110_v14  ;;  %v2243_v40 = vmul.f32 %v2211_v11, %v3152_v0  ;;  %v1084_v12 = vor.u32 1.1754944e-38, %v1083_v37 }
 0x17f   : > { %v1138_v52 = vadd.f32 0.18741608, %v1137_v44  ;;  %v3274_v5 = vadd.f32 %v3041_v2, %v804_v45  ;;  %vm1082_vm3 = vcmp.eq.f32.partialorder %v1081_v29, 8.507059e+37  ;;  %v3277_v57 = vmul.f32 0.5, %v3101_v30 }
 0x180   : > { %v1076_v47 = vadd.f32 %v2594_v63, %v1075_v1  ;;  %2595 = vrcp.f32 %v1111_v21  ;;  %2275 = vst [vmem:[#allocation8 + $0x10] sm:$0xff] %v2243_v40  ;;  %v3280_v0 = vmul.f32 %v1100_v8, %v3092_v23  ;;  %v1121_v9 = vand.u32 2147483647, %v1111_v21 }
 0x181   : > { %v1147_v60 = vadd.f32 0.112945676, %v1146_v49  ;;  %v805_v62 = vmul.f32 %v3039_v26, %v769_v22  ;;  %vm1117_vm4 = vweird.f32 %v1111_v21  ;;  %v3285_v19 = vmin.f32 %v1169_v3, 16.0 }
 0x182   : > { %v1080_v17 = vsel %vm3269_vm2, %v2594_v63, %v1076_v47  ;;  %v3288_v7 = vmul.f32 0.70710677, %v3274_v5  ;;  %v1123_v30 = vand.u32 2147483648, %v1111_v21  ;;  %v1139_v25 = vmul.f32 %v1138_v52, %v3155_v61 }
 0x183   : > { %v1085_v13 = vsel %vm1082_vm3, %v1084_v12, %v1080_v17  ;;  %v1148_v23 = vmul.f32 %v1147_v60, %v3155_v61  ;;  %v1171_v27 = vmul.f32 2.1237322e-06, %v3285_v19  ;;  %v1182_v42 = vmul.f32 3.8918573e-05, %v3285_v19 }
 0x184   : > { %v1086_v24 = vmul.f32 %v1085_v13, %v1061_v10  ;;  %v1209_v51 = vmul.f32 %v3288_v7, %v3288_v7  ;;  %vm3296_vm5 = vcmp.eq.f32.partialorder %v1121_v9, 8.507059e+37  ;;  %v3301_v29 = vmul.f32 0.5, %v3142_v48 }
 0x185   : > { %v1149_v53 = vadd.f32 0.4994258, %v1148_v23  ;;  %v3304_v28 = vadd.f32 %v3041_v2, %v805_v62  ;;  %v1172_v6 = vadd.f32 0.00028619796, %v1171_v27  ;;  %v1183_v46 = vadd.f32 0.001143296, %v1182_v42 }
 0x186   : > { %v2596_v31 = vpop.eup %2595  ;;  %v2487_v10 = vclamps-f32 %v1086_v24, 1.0  ;;  %v3306_v58 = vmin.f32 %v1209_v51, 16.0  ;;  %v1124_v20 = vor.u32 1.1754944e-38, %v1123_v30  ;;  %v1140_v11 = vadd.f32 1.1283791, %v1139_v25 }
 0x187   : > { %v1113_v63 = vmul.f32 %v2596_v31, %v1111_v21  ;;  %vm1118_vm6 = vweird.f32 %v2596_v31  ;;  %v1150_v55 = vmul.f32 %v1149_v53, %v3155_v61  ;;  %v3310_v32 = vmul.f32 0.70710677, %v3304_v28 }
 0x188   : > { %v2212_v34 = vadd.f32 1.0, %v2487_v10  ;;  %v1173_v48 = vmul.f32 %v1172_v6, %v3285_v19  ;;  %v1184_v50 = vmul.f32 %v1183_v46, %v3285_v19  ;;  %v1211_v35 = vmul.f32 2.1237322e-06, %v3306_v58  ;;  %vm3324_vm7 = vmor %vm1117_vm4, %vm1118_vm6 }
 0x189   : > { %v1114_v36 = vsub.f32 1.0, %v1113_v63  ;;  %v3315_v37 = vadd.f32 1.0, %v1150_v55  ;;  %v1222_v33 = vmul.f32 3.8918573e-05, %v3306_v58  ;;  %v1249_v16 = vmul.f32 %v3310_v32, %v3310_v32 }
 0x18a   : > { %v2244_v61 = vmul.f32 %v2212_v34, %v3160_v43  ;;  %v1174_v54 = vadd.f32 0.0036580483, %v1173_v48  ;;  %v1185_v41 = vadd.f32 0.014752088, %v1184_v50  ;;  %v1212_v59 = vadd.f32 0.00028619796, %v1211_v35 }
 0x18b   : > { %v1115_v14 = vmul.f32 %v2596_v31, %v1114_v36  ;;  %2597 = vrcp.f32 %v3315_v37  ;;  %v1163_v44 = vand.u32 2147483648, %v3315_v37  ;;  %v1223_v3 = vadd.f32 0.001143296, %v1222_v33 }
 0x18c   : > { %2276 = vst [vmem:[#allocation8 + $0x18] sm:$0xff] %v2244_v61  ;;  %v1175_v45 = vmul.f32 %v1174_v54, %v3285_v19  ;;  %v1186_v43 = vmul.f32 %v1185_v41, %v3285_v19  ;;  %v1213_v1 = vmul.f32 %v1212_v59, %v3306_v58  ;;  %v3332_v22 = vmin.f32 %v1249_v16, 16.0 }
 0x18d   : > { %v1116_v49 = vadd.f32 %v2596_v31, %v1115_v14  ;;  %v806_v40 = vmul.f32 %v3039_v26, %v770_v38  ;;  %vm1157_vm8 = vweird.f32 %v3315_v37  ;;  %v1161_v21 = vand.u32 2147483647, %v3315_v37 }
 0x18e   : > { %v1176_v4 = vadd.f32 0.05243302, %v1175_v45  ;;  %v1187_v12 = vadd.f32 0.112945676, %v1186_v43  ;;  %v1214_v47 = vadd.f32 0.0036580483, %v1213_v1  ;;  %v1224_v9 = vmul.f32 %v1223_v3, %v3306_v58 }
 0x18f   : > { %v1120_v52 = vsel %vm3324_vm7, %v2596_v31, %v1116_v49  ;;  %v1251_v60 = vmul.f32 2.1237322e-06, %v3332_v22  ;;  %v1164_v17 = vor.u32 1.1754944e-38, %v1163_v44  ;;  %v3349_v10 = vadd.f32 %v3041_v2, %v806_v40  ;;  %v771_v44 = vld [vmem:[#allocation7 + $0xe8] sm:$0xff] }
 0x190   : > { %v1125_v62 = vsel %vm3296_vm5, %v1124_v20, %v1120_v52  ;;  %v1177_v13 = vmul.f32 %v1176_v4, %v3285_v19  ;;  %v1188_v30 = vmul.f32 %v1187_v12, %v3285_v19  ;;  %v1215_v24 = vmul.f32 %v1214_v47, %v3306_v58  ;;  %v772_v47 = vld [vmem:[#allocation7 + $0xb8] sm:$0xff] }
 0x191   : > { %v2598_v25 = vpop.eup %2597  ;;  %v1126_v23 = vmul.f32 %v1125_v62, %v3280_v0  ;;  %v1225_v27 = vadd.f32 0.014752088, %v1224_v9  ;;  %v1252_v42 = vadd.f32 0.00028619796, %v1251_v60  ;;  %v1262_v61 = vmul.f32 3.8918573e-05, %v3332_v22 }
 0x192   : > { %v1153_v51 = vmul.f32 %v2598_v25, %v3315_v37  ;;  %v1178_v53 = vadd.f32 0.18741608, %v1177_v13  ;;  %v1189_v31 = vadd.f32 0.4994258, %v1188_v30  ;;  %v1216_v6 = vadd.f32 0.05243302, %v1215_v24 }
 0x193   : > { %v2488_v18 = vclamps-f32 %v1126_v23, 1.0  ;;  %v1226_v46 = vmul.f32 %v1225_v27, %v3306_v58  ;;  %v1253_v63 = vmul.f32 %v1252_v42, %v3332_v22  ;;  %vm1158_vm9 = vweird.f32 %v2598_v25 }
 0x194   : > { %v1154_v55 = vsub.f32 1.0, %v1153_v51  ;;  %v1179_v0 = vmul.f32 %v1178_v53, %v3285_v19  ;;  %v1190_v34 = vmul.f32 %v1189_v31, %v3285_v19  ;;  %v1217_v50 = vmul.f32 %v1216_v6, %v3306_v58  ;;  %vm3360_vm10 = vmor %vm1157_vm8, %vm1158_vm9 }
 0x195   : > { %v2213_v48 = vadd.f32 1.0, %v2488_v18  ;;  %v1227_v35 = vadd.f32 0.112945676, %v1226_v46  ;;  %v1254_v36 = vadd.f32 0.0036580483, %v1253_v63  ;;  %v1141_v20 = vmul.f32 %v1140_v11, %v3111_v39 }
 0x196   : > { %v1155_v33 = vmul.f32 %v2598_v25, %v1154_v55  ;;  %v1180_v16 = vadd.f32 1.1283791, %v1179_v0  ;;  %v1191_v38 = vadd.f32 1.0, %v1190_v34  ;;  %v1218_v59 = vadd.f32 0.18741608, %v1217_v50 }
 0x197   : > { %v2245_v54 = vmul.f32 %v2213_v48, %v3193_v15  ;;  %v1228_v19 = vmul.f32 %v1227_v35, %v3306_v58  ;;  %v1255_v14 = vmul.f32 %v1254_v36, %v3332_v22  ;;  %vm1162_vm11 = vcmp.eq.f32.partialorder %v1161_v21, 8.507059e+37 }
 0x198   : > { %v1156_v8 = vadd.f32 %v2598_v25, %v1155_v33  ;;  %2599 = vrcp.f32 %v1191_v38  ;;  %v1201_v45 = vand.u32 2147483647, %v1191_v38  ;;  %v3368_v15 = vmul.f32 0.5, %v3274_v5 }
 0x199   : > { %2277 = vst [vmem:[#allocation8 + $0x20] sm:$0xff] %v2245_v54  ;;  %v1229_v37 = vadd.f32 0.4994258, %v1228_v19  ;;  %v1256_v1 = vadd.f32 0.05243302, %v1255_v14  ;;  %v1181_v39 = vmul.f32 %v1180_v16, %v3258_v56  ;;  %v1219_v11 = vmul.f32 %v1218_v59, %v3306_v58  ;;  %v773_v16 = vld [vmem:[#allocation7 + $0x60] sm:$0xff] }
 0x19a   : > { %v1160_v43 = vsel %vm3360_vm10, %v2598_v25, %v1156_v8  ;;  %v1263_v49 = vadd.f32 0.001143296, %v1262_v61  ;;  %v3373_v3 = vmul.f32 0.70710677, %v3349_v10  ;;  %v3378_v21 = vmul.f32 0.5, %v3304_v28 }
 0x19b   : > { %v1165_v40 = vsel %vm1162_vm11, %v1164_v17, %v1160_v43  ;;  %v1230_v5 = vmul.f32 %v1229_v37, %v3306_v58  ;;  %v1257_v12 = vmul.f32 %v1256_v1, %v3332_v22  ;;  %vm1197_vm12 = vweird.f32 %v1191_v38 }
 0x19c   : > { %v1166_v4 = vmul.f32 %v1165_v40, %v1141_v20  ;;  %v1264_v52 = vmul.f32 %v1263_v49, %v3332_v22  ;;  %v1203_v9 = vand.u32 2147483648, %v1191_v38  ;;  %v1289_v60 = vmul.f32 %v3373_v3, %v3373_v3 }
 0x19d   : > { %v807_v56 = vmul.f32 %v3039_v26, %v771_v44  ;;  %vm3386_vm13 = vcmp.eq.f32.partialorder %v1201_v45, 8.507059e+37  ;;  %v1231_v13 = vadd.f32 1.0, %v1230_v5  ;;  %v1220_v25 = vadd.f32 1.1283791, %v1219_v11 }
 0x19e   : > { %v2600_v62 = vpop.eup %2599  ;;  %v2489_v17 = vclamps-f32 %v1166_v4, 1.0  ;;  %v1265_v58 = vadd.f32 0.014752088, %v1264_v52  ;;  %v1258_v23 = vadd.f32 0.18741608, %v1257_v12  ;;  %v808_v24 = vmul.f32 %v3039_v26, %v772_v47 }
 0x19f   : > { %v1193_v30 = vmul.f32 %v2600_v62, %v1191_v38  ;;  %vm1198_vm14 = vweird.f32 %v2600_v62  ;;  %2601 = vrcp.f32 %v1231_v13  ;;  %v3391_v42 = vmin.f32 %v1289_v60, 16.0 }
 0x1a0   : > { %v2214_v27 = vadd.f32 1.0, %v2489_v17  ;;  %v1241_v53 = vand.u32 2147483647, %v1231_v13  ;;  %v1266_v31 = vmul.f32 %v1265_v58, %v3332_v22  ;;  %v3395_v18 = vadd.f32 %v3041_v2, %v807_v56  ;;  %vm3402_vm0 = vmor %vm1197_vm12, %vm1198_vm14 }
 0x1a1   : > { %v1194_v51 = vsub.f32 1.0, %v1193_v30  ;;  %v1204_v46 = vor.u32 1.1754944e-38, %v1203_v9  ;;  %v1243_v63 = vand.u32 2147483648, %v1231_v13  ;;  %v1291_v55 = vmul.f32 2.1237322e-06, %v3391_v42 }
 0x1a2   : > { %v2246_v6 = vmul.f32 %v2214_v27, %v3277_v57  ;;  %v1221_v34 = vmul.f32 %v1220_v25, %v3288_v7  ;;  %vm1237_vm15 = vweird.f32 %v1231_v13  ;;  %v1267_v48 = vadd.f32 0.112945676, %v1266_v31 }
 0x1a3   : > { %v1195_v0 = vmul.f32 %v2600_v62, %v1194_v51  ;;  %v1259_v35 = vmul.f32 %v1258_v23, %v3332_v22  ;;  %v1292_v36 = vadd.f32 0.00028619796, %v1291_v55  ;;  %v1302_v57 = vmul.f32 3.8918573e-05, %v3391_v42 }
 0x1a4   : > { %2278 = vst [vmem:[#allocation8 + $0x28] sm:$0xff] %v2246_v6  ;;  %v3409_v33 = vadd.f32 %v3041_v2, %v808_v24  ;;  %vm3411_vm1 = vcmp.eq.f32.partialorder %v1241_v53, 8.507059e+37  ;;  %v1268_v38 = vmul.f32 %v1267_v48, %v3332_v22  ;;  %v3417_v54 = vmul.f32 0.70710677, %v3395_v18 }
 0x1a5   : > { %v1196_v61 = vadd.f32 %v2600_v62, %v1195_v0  ;;  %v2602_v41 = vpop.eup %2601  ;;  %v1244_v59 = vor.u32 1.1754944e-38, %v1243_v63  ;;  %v1293_v19 = vmul.f32 %v1292_v36, %v3391_v42  ;;  %v1303_v14 = vadd.f32 0.001143296, %v1302_v57 }
 0x1a6   : > { %v3421_v20 = vmul.f32 0.70710677, %v3409_v33  ;;  %v1233_v44 = vmul.f32 %v2602_v41, %v1231_v13  ;;  %v1269_v45 = vadd.f32 0.4994258, %v1268_v38  ;;  %v809_v37 = vmul.f32 %v3039_v26, %v773_v16 }
 0x1a7   : > { %v1200_v8 = vsel %vm3402_vm0, %v2600_v62, %v1196_v61  ;;  %v1294_v1 = vadd.f32 0.0036580483, %v1293_v19  ;;  %v1304_v49 = vmul.f32 %v1303_v14, %v3391_v42  ;;  %v1329_v40 = vmul.f32 %v3417_v54, %v3417_v54 }
 0x1a8   : > { %v1205_v43 = vsel %vm3386_vm13, %v1204_v46, %v1200_v8  ;;  %v1234_v4 = vsub.f32 1.0, %v1233_v44  ;;  %vm1238_vm2 = vweird.f32 %v2602_v41  ;;  %v1270_v5 = vmul.f32 %v1269_v45, %v3332_v22 }
 0x1a9   : > { %v1206_v11 = vmul.f32 %v1205_v43, %v1181_v39  ;;  %v1295_v12 = vmul.f32 %v1294_v1, %v3391_v42  ;;  %v1305_v52 = vadd.f32 0.014752088, %v1304_v49  ;;  %v3433_v47 = vmin.f32 %v1329_v40, 16.0  ;;  %vm3441_vm3 = vmor %vm1237_vm15, %vm1238_vm2 }
 0x1aa   : > { %v1369_v26 = vmul.f32 %v3421_v20, %v3421_v20  ;;  %v1235_v60 = vmul.f32 %v2602_v41, %v1234_v4  ;;  %v1271_v56 = vadd.f32 1.0, %v1270_v5  ;;  %v3438_v62 = vadd.f32 %v3041_v2, %v809_v37 }
 0x1ab   : > { %v2490_v9 = vclamps-f32 %v1206_v11, 1.0  ;;  %v1296_v22 = vadd.f32 0.05243302, %v1295_v12  ;;  %v1306_v17 = vmul.f32 %v1305_v52, %v3391_v42  ;;  %v1331_v28 = vmul.f32 2.1237322e-06, %v3433_v47 }
 0x1ac   : > { %v1342_v58 = vmul.f32 3.8918573e-05, %v3433_v47  ;;  %v1236_v25 = vadd.f32 %v2602_v41, %v1235_v60  ;;  %2603 = vrcp.f32 %v1271_v56  ;;  %v3449_v23 = vmul.f32 0.5, %v3349_v10 }
 0x1ad   : > { %v2215_v30 = vadd.f32 1.0, %v2490_v9  ;;  %v1260_v2 = vadd.f32 1.1283791, %v1259_v35  ;;  %v1297_v13 = vmul.f32 %v1296_v22, %v3391_v42  ;;  %v1307_v24 = vadd.f32 0.112945676, %v1306_v17 }
 0x1ae   : > { %v3452_v27 = vmin.f32 %v1369_v26, 16.0  ;;  %v1240_v53 = vsel %vm3441_vm3, %v2602_v41, %v1236_v25  ;;  %v1332_v31 = vadd.f32 0.00028619796, %v1331_v28  ;;  %v1343_v6 = vadd.f32 0.001143296, %v1342_v58 }
 0x1af   : > { %v2247_v51 = vmul.f32 %v2215_v30, %v3301_v29  ;;  %v1245_v46 = vsel %vm3411_vm1, %v1244_v59, %v1240_v53  ;;  %vm1277_vm4 = vweird.f32 %v1271_v56  ;;  %v1298_v63 = vadd.f32 0.18741608, %v1297_v13  ;;  %v3532_v9 = vld [vmem:[#allocation6] ss:$0 sm:$0xff] }
 0x1b0   : > { %v3460_v10 = vmul.f32 0.70710677, %v3438_v62  ;;  %v1246_v55 = vmul.f32 %v1245_v46, %v1221_v34  ;;  %v1281_v0 = vand.u32 2147483647, %v1271_v56  ;;  %v1308_v48 = vmul.f32 %v1307_v24, %v3391_v42 }
 0x1b1   : > { %2279 = vst [vmem:[#allocation8 + $0x30] sm:$0xff] %v2247_v51  ;;  %v1333_v29 = vmul.f32 %v1332_v31, %v3433_v47  ;;  %v1299_v50 = vmul.f32 %v1298_v63, %v3391_v42  ;;  %v1344_v35 = vmul.f32 %v1343_v6, %v3433_v47  ;;  %v1371_v36 = vmul.f32 2.1237322e-06, %v3452_v27  ;;  %v774_v6 = vld [vmem:[#allocation7 + $0xf0] sm:$0xff] }
 0x1b2   : > { %v1382_v57 = vmul.f32 3.8918573e-05, %v3452_v27  ;;  %v2604_v16 = vpop.eup %2603  ;;  %v2491_v61 = vclamps-f32 %v1246_v55, 1.0  ;;  %v1283_v7 = vand.u32 2147483648, %v1271_v56  ;;  %v1309_v38 = vadd.f32 0.4994258, %v1308_v48 }
 0x1b3   : > { %v1334_v41 = vadd.f32 0.0036580483, %v1333_v29  ;;  %v1273_v59 = vmul.f32 %v2604_v16, %v1271_v56  ;;  %vm1278_vm5 = vweird.f32 %v2604_v16  ;;  %v1345_v34 = vadd.f32 0.014752088, %v1344_v35 }
 0x1b4   : > { %v1409_v19 = vmul.f32 %v3460_v10, %v3460_v10  ;;  %v2216_v14 = vadd.f32 1.0, %v2491_v61  ;;  %v1310_v8 = vmul.f32 %v1309_v38, %v3391_v42  ;;  %v1372_v45 = vadd.f32 0.00028619796, %v1371_v36  ;;  %vm3479_vm6 = vmor %vm1277_vm4, %vm1278_vm5  ;;  %v3507_v61 = vld [vmem:[#allocation5] ss:$0 sm:$0xff] }
 0x1b5   : > { %v1335_v44 = vmul.f32 %v1334_v41, %v3433_v47  ;;  %v1274_v37 = vsub.f32 1.0, %v1273_v59  ;;  %v1300_v43 = vadd.f32 1.1283791, %v1299_v50  ;;  %v1346_v1 = vmul.f32 %v1345_v34, %v3433_v47 }
 0x1b6   : > { %v1383_v49 = vadd.f32 0.001143296, %v1382_v57  ;;  %v2248_v40 = vmul.f32 %v2216_v14, %v3368_v15  ;;  %v1311_v11 = vadd.f32 1.0, %v1310_v8  ;;  %v1373_v5 = vmul.f32 %v1372_v45, %v3452_v27 }
 0x1b7   : > { %v1336_v4 = vadd.f32 0.05243302, %v1335_v44  ;;  %v1261_v12 = vmul.f32 %v1260_v2, %v3310_v32  ;;  %v1275_v52 = vmul.f32 %v2604_v16, %v1274_v37  ;;  %v1347_v26 = vadd.f32 0.112945676, %v1346_v1 }
 0x1b8   : > { %v1384_v42 = vmul.f32 %v1383_v49, %v3452_v27  ;;  %2280 = vst [vmem:[#allocation8 + $0x38] sm:$0xff] %v2248_v40  ;;  %vm3483_vm7 = vcmp.eq.f32.partialorder %v1281_v0, 8.507059e+37  ;;  %v1284_v15 = vor.u32 1.1754944e-38, %v1283_v7  ;;  %2605 = vrcp.f32 %v1311_v11  ;;  %v775_v40 = vld [vmem:[#allocation7 + $0x8] sm:$0xff] }
 0x1b9   : > { %v3488_v39 = vmul.f32 0.5, %v3395_v18  ;;  %v1276_v32 = vadd.f32 %v2604_v16, %v1275_v52  ;;  %v1337_v22 = vmul.f32 %v1336_v4, %v3433_v47  ;;  %v1348_v17 = vmul.f32 %v1347_v26, %v3433_v47 }
 0x1ba   : > { %v1374_v28 = vadd.f32 0.0036580483, %v1373_v5  ;;  %v3493_v56 = vmul.f32 %v1300_v43, %v3373_v3  ;;  %v1321_v58 = vand.u32 2147483647, %v1311_v11  ;;  %v1385_v30 = vadd.f32 0.014752088, %v1384_v42 }
 0x1bb   : > { %v3495_v25 = vmin.f32 %v1409_v19, 16.0  ;;  %v1280_v2 = vsel %vm3479_vm6, %v2604_v16, %v1276_v32  ;;  %v1338_v13 = vadd.f32 0.18741608, %v1337_v22  ;;  %v1349_v24 = vadd.f32 0.4994258, %v1348_v17 }
 0x1bc   : > { %v1375_v18 = vmul.f32 %v1374_v28, %v3452_v27  ;;  %v1285_v51 = vsel %vm3483_vm7, %v1284_v15, %v1280_v2  ;;  %v1386_v53 = vmul.f32 %v1385_v30, %v3452_v27  ;;  %vm1317_vm8 = vweird.f32 %v1311_v11 }
 0x1bd   : > { %v1411_v31 = vmul.f32 2.1237322e-06, %v3495_v25  ;;  %v1422_v3 = vmul.f32 3.8918573e-05, %v3495_v25  ;;  %v1286_v46 = vmul.f32 %v1285_v51, %v1261_v12  ;;  %v1339_v63 = vmul.f32 %v1338_v13, %v3433_v47 }
 0x1be   : > { %v1350_v55 = vmul.f32 %v1349_v24, %v3433_v47  ;;  %v1376_v0 = vadd.f32 0.05243302, %v1375_v18  ;;  %v2606_v48 = vpop.eup %2605  ;;  %v1323_v29 = vand.u32 2147483648, %v1311_v11  ;;  %v1387_v50 = vadd.f32 0.112945676, %v1386_v53 }
 0x1bf   : > { %v1412_v35 = vadd.f32 0.00028619796, %v1411_v31  ;;  %v2492_v36 = vclamps-f32 %v1286_v46, 1.0  ;;  %v1313_v57 = vmul.f32 %v2606_v48, %v1311_v11  ;;  %v1423_v16 = vadd.f32 0.001143296, %v1422_v3 }
 0x1c0   : > { %v810_v7 = vmul.f32 %v3507_v61, %v774_v6  ;;  %v1340_v38 = vadd.f32 1.1283791, %v1339_v63  ;;  %v1351_v41 = vadd.f32 1.0, %v1350_v55  ;;  %v1377_v59 = vmul.f32 %v1376_v0, %v3452_v27 }
 0x1c1   : > { %v1388_v34 = vmul.f32 %v1387_v50, %v3452_v27  ;;  %v2217_v47 = vadd.f32 1.0, %v2492_v36  ;;  %v1314_v19 = vsub.f32 1.0, %v1313_v57  ;;  %vm1318_vm9 = vweird.f32 %v2606_v48 }
 0x1c2   : > { %v1413_v14 = vmul.f32 %v1412_v35, %v3495_v25  ;;  %vm3513_vm10 = vcmp.eq.f32.partialorder %v1321_v58, 8.507059e+37  ;;  %v1324_v44 = vor.u32 1.1754944e-38, %v1323_v29  ;;  %2607 = vrcp.f32 %v1351_v41  ;;  %vm3522_vm11 = vmor %vm1317_vm8, %vm1318_vm9 }
 0x1c3   : > { %v3518_v45 = vmul.f32 0.5, %v3409_v33  ;;  %v2249_v37 = vmul.f32 %v2217_v47, %v3378_v21  ;;  %v1315_v43 = vmul.f32 %v2606_v48, %v1314_v19  ;;  %v1378_v1 = vadd.f32 0.18741608, %v1377_v59 }
 0x1c4   : > { %v1389_v49 = vadd.f32 0.4994258, %v1388_v34  ;;  %v3527_v5 = vmul.f32 %v1340_v38, %v3417_v54  ;;  %v1361_v12 = vand.u32 2147483647, %v1351_v41  ;;  %v1414_v52 = vadd.f32 0.0036580483, %v1413_v14 }
 0x1c5   : > { %v1424_v26 = vmul.f32 %v1423_v16, %v3495_v25  ;;  %2281 = vst [vmem:[#allocation8 + $0x40] sm:$0xff] %v2249_v37  ;;  %v1316_v33 = vadd.f32 %v2606_v48, %v1315_v43  ;;  %v1379_v21 = vmul.f32 %v1378_v1, %v3452_v27  ;;  %v3535_v11 = vadd.f32 %v3532_v9, %v810_v7 }
 0x1c6   : > { %v1390_v42 = vmul.f32 %v1389_v49, %v3452_v27  ;;  %v1363_v60 = vand.u32 2147483648, %v1351_v41  ;;  %v1415_v15 = vmul.f32 %v1414_v52, %v3495_v25  ;;  %v811_v32 = vmul.f32 %v3507_v61, %v775_v40  ;;  %v776_v27 = vld [vmem:[#allocation7 + $0x78] sm:$0xff] }
 0x1c7   : > { %v1425_v54 = vadd.f32 0.014752088, %v1424_v26  ;;  %v1320_v22 = vsel %vm3522_vm11, %v2606_v48, %v1316_v33  ;;  %v1380_v17 = vadd.f32 1.1283791, %v1379_v21  ;;  %v3544_v58 = vmul.f32 0.70710677, %v3535_v11 }
 0x1c8   : > { %v3541_v28 = vadd.f32 1.0, %v1390_v42  ;;  %v2608_v30 = vpop.eup %2607  ;;  %v1325_v2 = vsel %vm3513_vm10, %v1324_v44, %v1320_v22  ;;  %v1416_v13 = vadd.f32 0.05243302, %v1415_v15  ;;  %v3550_v18 = vadd.f32 %v3532_v9, %v811_v32 }
 0x1c9   : > { %v1426_v24 = vmul.f32 %v1425_v54, %v3495_v25  ;;  %v1326_v51 = vmul.f32 %v1325_v2, %v3493_v56  ;;  %v1353_v53 = vmul.f32 %v2608_v30, %v1351_v41  ;;  %vm1357_vm12 = vweird.f32 %v1351_v41 }
 0x1ca   : > { %vm3553_vm13 = vcmp.eq.f32.partialorder %v1361_v12, 8.507059e+37  ;;  %vm1358_vm14 = vweird.f32 %v2608_v30  ;;  %v1364_v3 = vor.u32 1.1754944e-38, %v1363_v60  ;;  %2609 = vrcp.f32 %v3541_v28  ;;  %v777_v60 = vld [vmem:[#allocation7 + $0x38] sm:$0xff] }
 0x1cb   : > { %v812_v6 = vmul.f32 %v3507_v61, %v776_v27  ;;  %v2493_v46 = vclamps-f32 %v1326_v51, 1.0  ;;  %v1354_v63 = vsub.f32 1.0, %v1353_v53  ;;  %v1417_v55 = vmul.f32 %v1416_v13, %v3495_v25  ;;  %vm3572_vm15 = vmor %vm1357_vm12, %vm1358_vm14 }
 0x1cc   : > { %v1427_v0 = vadd.f32 0.112945676, %v1426_v24  ;;  %v3561_v48 = vmul.f32 %v1380_v17, %v3421_v20  ;;  %v1401_v56 = vand.u32 2147483647, %v3541_v28  ;;  %v1449_v29 = vmul.f32 %v3544_v58, %v3544_v58 }
 0x1cd   : > { %v3567_v50 = vmul.f32 0.70710677, %v3550_v18  ;;  %v2218_v35 = vadd.f32 1.0, %v2493_v46  ;;  %v1355_v36 = vmul.f32 %v2608_v30, %v1354_v63  ;;  %v1418_v57 = vadd.f32 0.18741608, %v1417_v55 }
 0x1ce   : > { %v1428_v16 = vmul.f32 %v1427_v0, %v3495_v25  ;;  %vm1397_vm0 = vweird.f32 %v3541_v28  ;;  %v1403_v20 = vand.u32 2147483648, %v3541_v28  ;;  %v3578_v38 = vmin.f32 %v1449_v29, 16.0 }
 0x1cf   : > { %v1489_v59 = vmul.f32 %v3567_v50, %v3567_v50  ;;  %v2250_v34 = vmul.f32 %v2218_v35, %v3449_v23  ;;  %v1356_v47 = vadd.f32 %v2608_v30, %v1355_v36  ;;  %v1419_v19 = vmul.f32 %v1418_v57, %v3495_v25 }
 0x1d0   : > { %v1429_v14 = vadd.f32 0.4994258, %v1428_v16  ;;  %v2610_v41 = vpop.eup %2609  ;;  %vm3584_vm1 = vcmp.eq.f32.partialorder %v1401_v56, 8.507059e+37  ;;  %v1451_v44 = vmul.f32 2.1237322e-06, %v3578_v38  ;;  %v3596_v40 = vadd.f32 %v3532_v9, %v812_v6 }
 0x1d1   : > { %v1462_v37 = vmul.f32 3.8918573e-05, %v3578_v38  ;;  %v3590_v43 = vmin.f32 %v1489_v59, 16.0  ;;  %2282 = vst [vmem:[#allocation8 + $0x48] sm:$0xff] %v2250_v34  ;;  %v1360_v1 = vsel %vm3572_vm15, %v2608_v30, %v1356_v47  ;;  %v1393_v23 = vmul.f32 %v2610_v41, %v3541_v28 }
 0x1d2   : > { %v1420_v49 = vadd.f32 1.1283791, %v1419_v19  ;;  %v1365_v4 = vsel %vm3553_vm13, %v1364_v3, %v1360_v1  ;;  %v1430_v12 = vmul.f32 %v1429_v14, %v3495_v25  ;;  %v1452_v52 = vadd.f32 0.00028619796, %v1451_v44 }
 0x1d3   : > { %v1463_v26 = vadd.f32 0.001143296, %v1462_v37  ;;  %v1366_v33 = vmul.f32 %v1365_v4, %v3527_v5  ;;  %v1394_v21 = vsub.f32 1.0, %v1393_v23  ;;  %vm1398_vm2 = vweird.f32 %v2610_v41 }
 0x1d4   : > { %v1491_v42 = vmul.f32 2.1237322e-06, %v3590_v43  ;;  %v3603_v15 = vadd.f32 1.0, %v1430_v12  ;;  %v1453_v54 = vmul.f32 %v1452_v52, %v3578_v38  ;;  %v1502_v22 = vmul.f32 3.8918573e-05, %v3590_v43  ;;  %vm3610_vm3 = vmor %vm1397_vm0, %vm1398_vm2 }
 0x1d5   : > { %v1464_v32 = vmul.f32 %v1463_v26, %v3578_v38  ;;  %v2494_v17 = vclamps-f32 %v1366_v33, 1.0  ;;  %v1395_v27 = vmul.f32 %v2610_v41, %v1394_v21  ;;  %v1404_v25 = vor.u32 1.1754944e-38, %v1403_v20 }
 0x1d6   : > { %v1492_v30 = vadd.f32 0.00028619796, %v1491_v42  ;;  %v3615_v2 = vmul.f32 %v1420_v49, %v3460_v10  ;;  %2611 = vrcp.f32 %v3603_v15  ;;  %v3619_v13 = vmul.f32 0.70710677, %v3596_v40 }
 0x1d7   : > { %v813_v24 = vmul.f32 %v3507_v61, %v777_v60  ;;  %v2219_v51 = vadd.f32 1.0, %v2494_v17  ;;  %v1396_v53 = vadd.f32 %v2610_v41, %v1395_v27  ;;  %v1454_v31 = vadd.f32 0.0036580483, %v1453_v54 }
 0x1d8   : > { %v1465_v3 = vadd.f32 0.014752088, %v1464_v32  ;;  %vm1437_vm4 = vweird.f32 %v3603_v15  ;;  %v1441_v28 = vand.u32 2147483647, %v3603_v15  ;;  %v1493_v6 = vmul.f32 %v1492_v30, %v3590_v43 }
 0x1d9   : > { %v1503_v46 = vadd.f32 0.001143296, %v1502_v22  ;;  %v2251_v10 = vmul.f32 %v2219_v51, %v3488_v39  ;;  %v1400_v63 = vsel %vm3610_vm3, %v2610_v41, %v1396_v53  ;;  %v1455_v55 = vmul.f32 %v1454_v31, %v3578_v38 }
 0x1da   : > { %v1466_v0 = vmul.f32 %v1465_v3, %v3578_v38  ;;  %v1405_v56 = vsel %vm3584_vm1, %v1404_v25, %v1400_v63  ;;  %v1494_v29 = vadd.f32 0.0036580483, %v1493_v6  ;;  %v1529_v36 = vmul.f32 %v3619_v13, %v3619_v13 }
 0x1db   : > { %v1504_v35 = vmul.f32 %v1503_v46, %v3590_v43  ;;  %2283 = vst [vmem:[#allocation8 + $0x50] sm:$0xff] %v2251_v10  ;;  %v1406_v57 = vmul.f32 %v1405_v56, %v3561_v48  ;;  %v1443_v39 = vand.u32 2147483648, %v3603_v15  ;;  %v1456_v16 = vadd.f32 0.05243302, %v1455_v55 }
 0x1dc   : > { %v1467_v7 = vadd.f32 0.112945676, %v1466_v0  ;;  %v2612_v20 = vpop.eup %2611  ;;  %v1495_v59 = vmul.f32 %v1494_v29, %v3590_v43  ;;  %v3638_v47 = vmin.f32 %v1529_v36, 16.0  ;;  %v3641_v19 = vadd.f32 %v3532_v9, %v813_v24 }
 0x1dd   : > { %v1505_v34 = vadd.f32 0.014752088, %v1504_v35  ;;  %v2495_v14 = vclamps-f32 %v1406_v57, 1.0  ;;  %v1433_v41 = vmul.f32 %v2612_v20, %v3603_v15  ;;  %vm1438_vm5 = vweird.f32 %v2612_v20 }
 0x1de   : > { %v1457_v8 = vmul.f32 %v1456_v16, %v3578_v38  ;;  %v1468_v48 = vmul.f32 %v1467_v7, %v3578_v38  ;;  %v1496_v44 = vadd.f32 0.05243302, %v1495_v59  ;;  %v1531_v1 = vmul.f32 2.1237322e-06, %v3638_v47  ;;  %vm3655_vm6 = vmor %vm1437_vm4, %vm1438_vm5  ;;  %v778_v59 = vld [vmem:[#allocation7 + $0x58] sm:$0xff] }
 0x1df   : > { %v1506_v37 = vmul.f32 %v1505_v34, %v3590_v43  ;;  %v2220_v23 = vadd.f32 1.0, %v2495_v14  ;;  %v1434_v49 = vsub.f32 1.0, %v1433_v41  ;;  %v1542_v12 = vmul.f32 3.8918573e-05, %v3638_v47 }
 0x1e0   : > { %v1458_v4 = vadd.f32 0.18741608, %v1457_v8  ;;  %v1444_v52 = vor.u32 1.1754944e-38, %v1443_v39  ;;  %v1469_v26 = vadd.f32 0.4994258, %v1468_v48  ;;  %v1497_v33 = vmul.f32 %v1496_v44, %v3590_v43 }
 0x1e1   : > { %v1507_v21 = vadd.f32 0.112945676, %v1506_v37  ;;  %v2252_v42 = vmul.f32 %v2220_v23, %v3518_v45  ;;  %v1435_v60 = vmul.f32 %v2612_v20, %v1434_v49  ;;  %v1532_v32 = vadd.f32 0.00028619796, %v1531_v1 }
 0x1e2   : > { %v1459_v54 = vmul.f32 %v1458_v4, %v3578_v38  ;;  %v1470_v17 = vmul.f32 %v1469_v26, %v3578_v38  ;;  %v1498_v27 = vadd.f32 0.18741608, %v1497_v33  ;;  %v1543_v30 = vadd.f32 0.001143296, %v1542_v12 }
 0x1e3   : > { %v1508_v25 = vmul.f32 %v1507_v21, %v3590_v43  ;;  %2284 = vst [vmem:[#allocation8 + $0x58] sm:$0xff] %v2252_v42  ;;  %v1436_v5 = vadd.f32 %v2612_v20, %v1435_v60  ;;  %vm1442_vm7 = vcmp.eq.f32.partialorder %v1441_v28, 8.507059e+37  ;;  %v1533_v45 = vmul.f32 %v1532_v32, %v3638_v47  ;;  %v779_v42 = vld [vmem:[#allocation7 + $0x40] sm:$0xff] }
 0x1e4   : > { %v3663_v24 = vmul.f32 0.70710677, %v3641_v19  ;;  %v1460_v51 = vadd.f32 1.1283791, %v1459_v54  ;;  %v1471_v15 = vadd.f32 1.0, %v1470_v17  ;;  %v1544_v31 = vmul.f32 %v1543_v30, %v3638_v47 }
 0x1e5   : > { %v1509_v53 = vadd.f32 0.4994258, %v1508_v25  ;;  %v877_v3 = vmul.f32 0.5, %v3438_v62  ;;  %v1440_v38 = vsel %vm3655_vm6, %v2612_v20, %v1436_v5  ;;  %v1534_v6 = vadd.f32 0.0036580483, %v1533_v45 }
 0x1e6   : > { %v1569_v46 = vmul.f32 %v3663_v24, %v3663_v24  ;;  %v1445_v28 = vsel %vm1442_vm7, %v1444_v52, %v1440_v38  ;;  %v3672_v10 = vmul.f32 0.5, %v3535_v11  ;;  %2613 = vrcp.f32 %v1471_v15 }
 0x1e7   : > { %v1499_v63 = vmul.f32 %v1498_v27, %v3590_v43  ;;  %v1446_v55 = vmul.f32 %v1445_v28, %v3615_v2  ;;  %v3677_v0 = vmul.f32 0.5, %v3550_v18  ;;  %v1510_v62 = vmul.f32 %v1509_v53, %v3590_v43 }
 0x1e8   : > { %v3681_v56 = vmul.f32 0.5, %v3596_v40  ;;  %v3684_v29 = vmul.f32 %v1460_v51, %v3544_v58  ;;  %v1535_v35 = vmul.f32 %v1534_v6, %v3638_v47  ;;  %v1545_v11 = vadd.f32 0.014752088, %v1544_v31 }
 0x1e9   : > { %v3687_v36 = vmin.f32 %v1569_v46, 16.0  ;;  %v2496_v57 = vclamps-f32 %v1446_v55, 1.0  ;;  %v1481_v39 = vand.u32 2147483647, %v1471_v15  ;;  %v1483_v16 = vand.u32 2147483648, %v1471_v15 }
 0x1ea   : > { %v1511_v2 = vadd.f32 1.0, %v1510_v62  ;;  %v1500_v7 = vadd.f32 1.1283791, %v1499_v63  ;;  %v1536_v18 = vadd.f32 0.05243302, %v1535_v35  ;;  %v1546_v20 = vmul.f32 %v1545_v11, %v3638_v47  ;;  %v780_v63 = vld [vmem:[#allocation7 + $0xc8] sm:$0xff] }
 0x1eb   : > { %v1571_v43 = vmul.f32 2.1237322e-06, %v3687_v36  ;;  %v2221_v40 = vadd.f32 1.0, %v2496_v57  ;;  %vm1477_vm8 = vweird.f32 %v1471_v15  ;;  %v1582_v58 = vmul.f32 3.8918573e-05, %v3687_v36 }
 0x1ec   : > { %2615 = vrcp.f32 %v1511_v2  ;;  %v2614_v34 = vpop.eup %2613  ;;  %v1521_v14 = vand.u32 2147483647, %v1511_v2  ;;  %v1537_v41 = vmul.f32 %v1536_v18, %v3638_v47  ;;  %v1547_v8 = vadd.f32 0.112945676, %v1546_v20 }
 0x1ed   : > { %v1572_v48 = vadd.f32 0.00028619796, %v1571_v43  ;;  %v2253_v44 = vmul.f32 %v2221_v40, %v877_v3  ;;  %v1473_v37 = vmul.f32 %v2614_v34, %v1471_v15  ;;  %vm3693_vm9 = vcmp.eq.f32.partialorder %v1481_v39, 8.507059e+37 }
 0x1ee   : > { %v1484_v23 = vor.u32 1.1754944e-38, %v1483_v16  ;;  %vm1478_vm10 = vweird.f32 %v2614_v34  ;;  %v1501_v49 = vmul.f32 %v1500_v7, %v3567_v50  ;;  %v1523_v4 = vand.u32 2147483648, %v1511_v2 }
 0x1ef   : > { %v1548_v12 = vmul.f32 %v1547_v8, %v3638_v47  ;;  %2285 = vst [vmem:[#allocation8 + $0x60] sm:$0xff] %v2253_v44  ;;  %v1474_v52 = vsub.f32 1.0, %v1473_v37  ;;  %v1573_v26 = vmul.f32 %v1572_v48, %v3687_v36  ;;  %v1583_v33 = vadd.f32 0.001143296, %v1582_v58  ;;  %vm3711_vm13 = vmor %vm1477_vm8, %vm1478_vm10 }
 0x1f0   : > { %v814_v21 = vmul.f32 %v3507_v61, %v778_v59  ;;  %vm1517_vm11 = vweird.f32 %v1511_v2  ;;  %vm3701_vm12 = vcmp.eq.f32.partialorder %v1521_v14, 8.507059e+37  ;;  %v1538_v54 = vadd.f32 0.18741608, %v1537_v41 }
 0x1f1   : > { %v1549_v32 = vadd.f32 0.4994258, %v1548_v12  ;;  %v1475_v50 = vmul.f32 %v2614_v34, %v1474_v52  ;;  %v1574_v17 = vadd.f32 0.0036580483, %v1573_v26  ;;  %v1584_v27 = vmul.f32 %v1583_v33, %v3687_v36 }
 0x1f2   : > { %v2616_v22 = vpop.eup %2615  ;;  %v3707_v25 = vadd.f32 %v3532_v9, %v814_v21  ;;  %v1524_v45 = vor.u32 1.1754944e-38, %v1523_v4  ;;  %v815_v53 = vmul.f32 %v3507_v61, %v779_v42  ;;  %v1539_v15 = vmul.f32 %v1538_v54, %v3638_v47 }
 0x1f3   : > { %v1513_v5 = vmul.f32 %v2616_v22, %v1511_v2  ;;  %v1550_v51 = vmul.f32 %v1549_v32, %v3638_v47  ;;  %v1476_v31 = vadd.f32 %v2614_v34, %v1475_v50  ;;  %v1575_v3 = vmul.f32 %v1574_v17, %v3687_v36 }
 0x1f4   : > { %v1585_v38 = vadd.f32 0.014752088, %v1584_v27  ;;  %v3719_v6 = vmul.f32 0.70710677, %v3707_v25  ;;  %vm1518_vm14 = vweird.f32 %v2616_v22  ;;  %v3730_v16 = vmul.f32 0.5, %v3641_v19 }
 0x1f5   : > { %v1514_v46 = vsub.f32 1.0, %v1513_v5  ;;  %v1551_v28 = vadd.f32 1.0, %v1550_v51  ;;  %v1480_v55 = vsel %vm3711_vm13, %v2614_v34, %v1476_v31  ;;  %v1576_v62 = vadd.f32 0.05243302, %v1575_v3  ;;  %vm3734_vm15 = vmor %vm1517_vm11, %vm1518_vm14 }
 0x1f6   : > { %v1586_v35 = vmul.f32 %v1585_v38, %v3687_v36  ;;  %v1609_v11 = vmul.f32 %v3719_v6, %v3719_v6  ;;  %v1485_v57 = vsel %vm3693_vm9, %v1484_v23, %v1480_v55  ;;  %v3740_v20 = vadd.f32 %v3532_v9, %v815_v53 }
 0x1f7   : > { %v1515_v39 = vmul.f32 %v2616_v22, %v1514_v46  ;;  %2617 = vrcp.f32 %v1551_v28  ;;  %v1486_v47 = vmul.f32 %v1485_v57, %v3684_v29  ;;  %v1577_v18 = vmul.f32 %v1576_v62, %v3687_v36 }
 0x1f8   : > { %v816_v43 = vmul.f32 %v3507_v61, %v780_v63  ;;  %v1540_v58 = vadd.f32 1.1283791, %v1539_v15  ;;  %v1587_v59 = vadd.f32 0.112945676, %v1586_v35  ;;  %v3743_v34 = vmin.f32 %v1609_v11, 16.0 }
 0x1f9   : > { %v1516_v40 = vadd.f32 %v2616_v22, %v1515_v39  ;;  %v2497_v19 = vclamps-f32 %v1486_v47, 1.0  ;;  %vm1557_vm0 = vweird.f32 %v1551_v28  ;;  %v1561_v29 = vand.u32 2147483647, %v1551_v28 }
 0x1fa   : > { %v1578_v2 = vadd.f32 0.18741608, %v1577_v18  ;;  %v1588_v41 = vmul.f32 %v1587_v59, %v3687_v36  ;;  %v1611_v8 = vmul.f32 2.1237322e-06, %v3743_v34  ;;  %v1622_v48 = vmul.f32 3.8918573e-05, %v3743_v34 }
 0x1fb   : > { %v1520_v14 = vsel %vm3734_vm15, %v2616_v22, %v1516_v40  ;;  %v2222_v44 = vadd.f32 1.0, %v2497_v19  ;;  %v3754_v23 = vmul.f32 0.70710677, %v3740_v20  ;;  %v1563_v54 = vand.u32 2147483648, %v1551_v28 }
 0x1fc   : > { %v1525_v37 = vsel %vm3701_vm12, %v1524_v45, %v1520_v14  ;;  %v1579_v1 = vmul.f32 %v1578_v2, %v3687_v36  ;;  %v1589_v52 = vadd.f32 0.4994258, %v1588_v41  ;;  %v1612_v26 = vadd.f32 0.00028619796, %v1611_v8 }
 0x1fd   : > { %v2618_v4 = vpop.eup %2617  ;;  %v1526_v12 = vmul.f32 %v1525_v37, %v1501_v49  ;;  %v1623_v33 = vadd.f32 0.001143296, %v1622_v48  ;;  %v2254_v21 = vmul.f32 %v2222_v44, %v3672_v10  ;;  %v1649_v49 = vmul.f32 %v3754_v23, %v3754_v23 }
 0x1fe   : > { %v1553_v42 = vmul.f32 %v2618_v4, %v1551_v28  ;;  %vm1558_vm1 = vweird.f32 %v2618_v4  ;;  %v1590_v22 = vmul.f32 %v1589_v52, %v3687_v36  ;;  %v1613_v60 = vmul.f32 %v1612_v26, %v3743_v34 }
 0x1ff   : > { %v2498_v32 = vclamps-f32 %v1526_v12, 1.0  ;;  %v1624_v50 = vmul.f32 %v1623_v33, %v3743_v34  ;;  %2286 = vst [vmem:[#allocation8 + $0x68] sm:$0xff] %v2254_v21  ;;  %v1580_v27 = vadd.f32 1.1283791, %v1579_v1  ;;  %v3763_v30 = vadd.f32 %v3532_v9, %v816_v43  ;;  %vm3776_vm2 = vmor %vm1557_vm0, %vm1558_vm1 }
 0x200   : > { %v1554_v17 = vsub.f32 1.0, %v1553_v42  ;;  %v3765_v5 = vadd.f32 1.0, %v1590_v22  ;;  %v1614_v45 = vadd.f32 0.0036580483, %v1613_v60  ;;  %v1541_v36 = vmul.f32 %v1540_v58, %v3619_v13  ;;  %v781_v13 = vld [vmem:[#allocation7 + $0xe0] sm:$0xff]  ;;  %v782_v58 = vld [vmem:[#allocation7 + $0x90] sm:$0xff] }
 0x201   : > { %v2223_v10 = vadd.f32 1.0, %v2498_v32  ;;  %v1625_v51 = vadd.f32 0.014752088, %v1624_v50  ;;  %v3768_v31 = vmin.f32 %v1649_v49, 16.0  ;;  %v3771_v3 = vmul.f32 0.70710677, %v3763_v30 }
 0x202   : > { %v1555_v53 = vmul.f32 %v2618_v4, %v1554_v17  ;;  %vm3780_vm3 = vcmp.eq.f32.partialorder %v1561_v29, 8.507059e+37  ;;  %v1564_v63 = vor.u32 1.1754944e-38, %v1563_v54  ;;  %2619 = vrcp.f32 %v3765_v5 }
 0x203   : > { %v2255_v38 = vmul.f32 %v2223_v10, %v3677_v0  ;;  %v3786_v62 = vmul.f32 0.5, %v3707_v25  ;;  %v1615_v0 = vmul.f32 %v1614_v45, %v3743_v34  ;;  %v1626_v28 = vmul.f32 %v1625_v51, %v3743_v34  ;;  %v783_v51 = vld [vmem:[#allocation7 + $0x70] sm:$0xff] }
 0x204   : > { %v1556_v55 = vadd.f32 %v2618_v4, %v1555_v53  ;;  %v3791_v35 = vmul.f32 %v1580_v27, %v3663_v24  ;;  %v1651_v11 = vmul.f32 2.1237322e-06, %v3768_v31  ;;  %v1662_v57 = vmul.f32 3.8918573e-05, %v3768_v31 }
 0x205   : > { %2287 = vst [vmem:[#allocation8 + $0x70] sm:$0xff] %v2255_v38  ;;  %v1689_v39 = vmul.f32 %v3771_v3, %v3771_v3  ;;  %v1616_v25 = vadd.f32 0.05243302, %v1615_v0  ;;  %v1627_v7 = vadd.f32 0.112945676, %v1626_v28  ;;  %v817_v18 = vmul.f32 %v3507_v61, %v781_v13 }
 0x206   : > { %v1560_v47 = vsel %vm3776_vm2, %v2618_v4, %v1556_v55  ;;  %vm1597_vm4 = vweird.f32 %v3765_v5  ;;  %v1652_v24 = vadd.f32 0.00028619796, %v1651_v11  ;;  %v1663_v40 = vadd.f32 0.001143296, %v1662_v57 }
 0x207   : > { %v1565_v43 = vsel %vm3780_vm3, %v1564_v63, %v1560_v47  ;;  %v1601_v19 = vand.u32 2147483647, %v3765_v5  ;;  %v1617_v29 = vmul.f32 %v1616_v25, %v3743_v34  ;;  %v1628_v2 = vmul.f32 %v1627_v7, %v3743_v34 }
 0x208   : > { %v1566_v59 = vmul.f32 %v1565_v43, %v1541_v36  ;;  %v2620_v14 = vpop.eup %2619  ;;  %v1603_v41 = vand.u32 2147483648, %v3765_v5  ;;  %v1653_v8 = vmul.f32 %v1652_v24, %v3768_v31  ;;  %v1664_v48 = vmul.f32 %v1663_v40, %v3768_v31 }
 0x209   : > { %v3809_v44 = vmin.f32 %v1689_v39, 16.0  ;;  %v1593_v1 = vmul.f32 %v2620_v14, %v3765_v5  ;;  %v1618_v4 = vadd.f32 0.18741608, %v1617_v29  ;;  %v818_v12 = vmul.f32 %v3507_v61, %v782_v58 }
 0x20a   : > { %v2499_v37 = vclamps-f32 %v1566_v59, 1.0  ;;  %vm1598_vm5 = vweird.f32 %v2620_v14  ;;  %v1629_v52 = vadd.f32 0.4994258, %v1628_v2  ;;  %v1654_v26 = vadd.f32 0.0036580483, %v1653_v8 }
 0x20b   : > { %v1665_v33 = vadd.f32 0.014752088, %v1664_v48  ;;  %v1594_v42 = vsub.f32 1.0, %v1593_v1  ;;  %v1619_v54 = vmul.f32 %v1618_v4, %v3743_v34  ;;  %v1691_v32 = vmul.f32 2.1237322e-06, %v3809_v44  ;;  %vm3823_vm6 = vmor %vm1597_vm4, %vm1598_vm5 }
 0x20c   : > { %v2224_v21 = vadd.f32 1.0, %v2499_v37  ;;  %v1630_v22 = vmul.f32 %v1629_v52, %v3743_v34  ;;  %v1655_v60 = vmul.f32 %v1654_v26, %v3768_v31  ;;  %v1702_v17 = vmul.f32 3.8918573e-05, %v3809_v44 }
 0x20d   : > { %v1666_v50 = vmul.f32 %v1665_v33, %v3768_v31  ;;  %v1595_v49 = vmul.f32 %v2620_v14, %v1594_v42  ;;  %v1620_v10 = vadd.f32 1.1283791, %v1619_v54  ;;  %v1692_v45 = vadd.f32 0.00028619796, %v1691_v32 }
 0x20e   : > { %v2256_v27 = vmul.f32 %v2224_v21, %v3681_v56  ;;  %v1604_v34 = vor.u32 1.1754944e-38, %v1603_v41  ;;  %v1631_v53 = vadd.f32 1.0, %v1630_v22  ;;  %v1656_v38 = vadd.f32 0.05243302, %v1655_v60 }
 0x20f   : > { %v1667_v46 = vadd.f32 0.112945676, %v1666_v50  ;;  %v1596_v15 = vadd.f32 %v2620_v14, %v1595_v49  ;;  %vm1602_vm7 = vcmp.eq.f32.partialorder %v1601_v19, 8.507059e+37  ;;  %v1693_v56 = vmul.f32 %v1692_v45, %v3809_v44 }
 0x210   : > { %2288 = vst [vmem:[#allocation8 + $0x78] sm:$0xff] %v2256_v27  ;;  %v1703_v63 = vadd.f32 0.001143296, %v1702_v17  ;;  %2621 = vrcp.f32 %v1631_v53  ;;  %v3829_v13 = vmul.f32 0.5, %v3740_v20  ;;  %v3832_v5 = vadd.f32 %v3532_v9, %v817_v18 }
 0x211   : > { %v3835_v55 = vadd.f32 %v3532_v9, %v818_v12  ;;  %v1600_v0 = vsel %vm3823_vm6, %v2620_v14, %v1596_v15  ;;  %v1657_v28 = vmul.f32 %v1656_v38, %v3768_v31  ;;  %v1668_v11 = vmul.f32 %v1667_v46, %v3768_v31 }
 0x212   : > { %v819_v57 = vmul.f32 %v3507_v61, %v783_v51  ;;  %v1605_v39 = vsel %vm1602_vm7, %v1604_v34, %v1600_v0  ;;  %v3843_v47 = vmul.f32 %v1620_v10, %v3719_v6  ;;  %vm1637_vm8 = vweird.f32 %v1631_v53 }
 0x213   : > { %v1694_v20 = vadd.f32 0.0036580483, %v1693_v56  ;;  %v1606_v25 = vmul.f32 %v1605_v39, %v3791_v35  ;;  %v1658_v7 = vadd.f32 0.18741608, %v1657_v28  ;;  %v1669_v18 = vadd.f32 0.4994258, %v1668_v11 }
 0x214   : > { %v1704_v43 = vmul.f32 %v1703_v63, %v3809_v44  ;;  %v1641_v24 = vand.u32 2147483647, %v1631_v53  ;;  %v3849_v58 = vmul.f32 0.70710677, %v3832_v5  ;;  %v3852_v59 = vmul.f32 0.70710677, %v3835_v55 }
 0x215   : > { %v1695_v40 = vmul.f32 %v1694_v20, %v3809_v44  ;;  %v2500_v19 = vclamps-f32 %v1606_v25, 1.0  ;;  %v1670_v6 = vmul.f32 %v1669_v18, %v3768_v31  ;;  %v3856_v2 = vadd.f32 %v3532_v9, %v819_v57 }
 0x216   : > { %v1705_v29 = vadd.f32 0.014752088, %v1704_v43  ;;  %v2622_v35 = vpop.eup %2621  ;;  %v1659_v14 = vmul.f32 %v1658_v7, %v3768_v31  ;;  %v1729_v8 = vmul.f32 %v3849_v58, %v3849_v58  ;;  %v1769_v48 = vmul.f32 %v3852_v59, %v3852_v59 }
 0x217   : > { %v1696_v41 = vadd.f32 0.05243302, %v1695_v40  ;;  %v2225_v37 = vadd.f32 1.0, %v2500_v19  ;;  %v1633_v1 = vmul.f32 %v2622_v35, %v1631_v53  ;;  %v1643_v4 = vand.u32 2147483648, %v1631_v53 }
 0x218   : > { %v3864_v12 = vmul.f32 0.5, %v3763_v30  ;;  %v1671_v52 = vadd.f32 1.0, %v1670_v6  ;;  %v1706_v33 = vmul.f32 %v1705_v29, %v3809_v44  ;;  %v3868_v21 = vmin.f32 %v1729_v8, 16.0 }
 0x219   : > { %v1697_v26 = vmul.f32 %v1696_v41, %v3809_v44  ;;  %v2257_v31 = vmul.f32 %v2225_v37, %v3730_v16  ;;  %v1634_v42 = vsub.f32 1.0, %v1633_v1  ;;  %vm1638_vm9 = vweird.f32 %v2622_v35 }
 0x21a   : > { %v3872_v54 = vmul.f32 0.70710677, %v3856_v2  ;;  %v1660_v32 = vadd.f32 1.1283791, %v1659_v14  ;;  %2623 = vrcp.f32 %v1671_v52  ;;  %v1681_v22 = vand.u32 2147483647, %v1671_v52  ;;  %vm3881_vm11 = vmor %vm1637_vm8, %vm1638_vm9 }
 0x21b   : > { %v3874_v60 = vmin.f32 %v1769_v48, 16.0  ;;  %2289 = vst [vmem:[#allocation8 + $0x80] sm:$0xff] %v2257_v31  ;;  %v1635_v30 = vmul.f32 %v2622_v35, %v1634_v42  ;;  %vm3876_vm10 = vcmp.eq.f32.partialorder %v1641_v24, 8.507059e+37  ;;  %v1698_v17 = vadd.f32 0.18741608, %v1697_v26 }
 0x21c   : > { %v1707_v27 = vadd.f32 0.112945676, %v1706_v33  ;;  %v1644_v49 = vor.u32 1.1754944e-38, %v1643_v4  ;;  %v1683_v10 = vand.u32 2147483648, %v1671_v52  ;;  %v1731_v45 = vmul.f32 2.1237322e-06, %v3868_v21 }
 0x21d   : > { %v1742_v51 = vmul.f32 3.8918573e-05, %v3868_v21  ;;  %v1636_v36 = vadd.f32 %v2622_v35, %v1635_v30  ;;  %v1699_v34 = vmul.f32 %v1698_v17, %v3809_v44  ;;  %v1771_v46 = vmul.f32 2.1237322e-06, %v3874_v60 }
 0x21e   : > { %v1708_v38 = vmul.f32 %v1707_v27, %v3809_v44  ;;  %vm1677_vm12 = vweird.f32 %v1671_v52  ;;  %v1732_v15 = vadd.f32 0.00028619796, %v1731_v45  ;;  %v1782_v56 = vmul.f32 3.8918573e-05, %v3874_v60 }
 0x21f   : > { %v1743_v53 = vadd.f32 0.001143296, %v1742_v51  ;;  %v1640_v63 = vsel %vm3881_vm11, %v2622_v35, %v1636_v36  ;;  %v1772_v28 = vadd.f32 0.00028619796, %v1771_v46  ;;  %v1809_v11 = vmul.f32 %v3872_v54, %v3872_v54 }
 0x220   : > { %v1709_v0 = vadd.f32 0.4994258, %v1708_v38  ;;  %v2624_v57 = vpop.eup %2623  ;;  %v1645_v39 = vsel %vm3876_vm10, %v1644_v49, %v1640_v63  ;;  %v1733_v20 = vmul.f32 %v1732_v15, %v3868_v21  ;;  %v1783_v7 = vadd.f32 0.001143296, %v1782_v56 }
 0x221   : > { %v1744_v25 = vmul.f32 %v1743_v53, %v3868_v21  ;;  %v1646_v18 = vmul.f32 %v1645_v39, %v3843_v47  ;;  %v1673_v43 = vmul.f32 %v2624_v57, %v1671_v52  ;;  %vm1678_vm13 = vweird.f32 %v2624_v57 }
 0x222   : > { %v1700_v24 = vadd.f32 1.1283791, %v1699_v34  ;;  %v1710_v40 = vmul.f32 %v1709_v0, %v3809_v44  ;;  %v1734_v19 = vadd.f32 0.0036580483, %v1733_v20  ;;  %v1773_v29 = vmul.f32 %v1772_v28, %v3874_v60  ;;  %vm3910_vm14 = vmor %vm1677_vm12, %vm1678_vm13 }
 0x223   : > { %v1745_v6 = vadd.f32 0.014752088, %v1744_v25  ;;  %v2501_v35 = vclamps-f32 %v1646_v18, 1.0  ;;  %v1674_v14 = vsub.f32 1.0, %v1673_v43  ;;  %v1784_v41 = vmul.f32 %v1783_v7, %v3874_v60 }
 0x224   : > { %v3903_v8 = vmin.f32 %v1809_v11, 16.0  ;;  %v1711_v48 = vadd.f32 1.0, %v1710_v40  ;;  %v1735_v37 = vmul.f32 %v1734_v19, %v3868_v21  ;;  %v1774_v1 = vadd.f32 0.0036580483, %v1773_v29 }
 0x225   : > { %v1746_v47 = vmul.f32 %v1745_v6, %v3868_v21  ;;  %v2226_v4 = vadd.f32 1.0, %v2501_v35  ;;  %v1661_v26 = vmul.f32 %v1660_v32, %v3754_v23  ;;  %v1675_v44 = vmul.f32 %v2624_v57, %v1674_v14 }
 0x226   : > { %v1785_v33 = vadd.f32 0.014752088, %v1784_v41  ;;  %vm3914_vm15 = vcmp.eq.f32.partialorder %v1681_v22, 8.507059e+37  ;;  %v1684_v30 = vor.u32 1.1754944e-38, %v1683_v10  ;;  %2625 = vrcp.f32 %v1711_v48 }
 0x227   : > { %v1811_v50 = vmul.f32 2.1237322e-06, %v3903_v8  ;;  %v2258_v17 = vmul.f32 %v2226_v4, %v3786_v62  ;;  %v1676_v27 = vadd.f32 %v2624_v57, %v1675_v44  ;;  %v1736_v23 = vadd.f32 0.05243302, %v1735_v37 }
 0x228   : > { %v1747_v32 = vadd.f32 0.112945676, %v1746_v47  ;;  %v3921_v16 = vmul.f32 %v1700_v24, %v3771_v3  ;;  %vm1717_vm0 = vweird.f32 %v1711_v48  ;;  %v3924_v52 = vmul.f32 0.5, %v3832_v5 }
 0x229   : > { %v1775_v22 = vmul.f32 %v1774_v1, %v3874_v60  ;;  %2290 = vst [vmem:[#allocation8 + $0x88] sm:$0xff] %v2258_v17  ;;  %v1680_v49 = vsel %vm3910_vm14, %v2624_v57, %v1676_v27  ;;  %v1737_v10 = vmul.f32 %v1736_v23, %v3868_v21  ;;  %v1786_v45 = vmul.f32 %v1785_v33, %v3874_v60  ;;  %v784_v1 = vld [vmem:[#allocation7 + $0xc0] sm:$0xff]  ;;  %v785_v23 = vld [vmem:[#allocation7 + $0xa8] sm:$0xff] }
 0x22a   : > { %v1748_v62 = vmul.f32 %v1747_v32, %v3868_v21  ;;  %v1685_v3 = vsel %vm3914_vm15, %v1684_v30, %v1680_v49  ;;  %v1812_v36 = vadd.f32 0.00028619796, %v1811_v50  ;;  %v1822_v5 = vmul.f32 3.8918573e-05, %v3903_v8 }
 0x22b   : > { %v1776_v51 = vadd.f32 0.05243302, %v1775_v22  ;;  %v1686_v34 = vmul.f32 %v1685_v3, %v1661_v26  ;;  %v1738_v38 = vadd.f32 0.18741608, %v1737_v10  ;;  %v1787_v15 = vadd.f32 0.112945676, %v1786_v45 }
 0x22c   : > { %v1749_v46 = vadd.f32 0.4994258, %v1748_v62  ;;  %v2626_v53 = vpop.eup %2625  ;;  %v1721_v56 = vand.u32 2147483647, %v1711_v48  ;;  %v1813_v0 = vmul.f32 %v1812_v36, %v3903_v8  ;;  %v1823_v28 = vadd.f32 0.001143296, %v1822_v5 }
 0x22d   : > { %v1777_v63 = vmul.f32 %v1776_v51, %v3874_v60  ;;  %v2502_v11 = vclamps-f32 %v1686_v34, 1.0  ;;  %v1713_v57 = vmul.f32 %v2626_v53, %v1711_v48  ;;  %v1723_v39 = vand.u32 2147483648, %v1711_v48  ;;  %v3985_v3 = vld [vmem:[#allocation5] ss:$0 sm:$0xff] }
 0x22e   : > { %v1739_v20 = vmul.f32 %v1738_v38, %v3868_v21  ;;  %v1750_v25 = vmul.f32 %v1749_v46, %v3868_v21  ;;  %v1788_v18 = vmul.f32 %v1787_v15, %v3874_v60  ;;  %v1814_v43 = vadd.f32 0.0036580483, %v1813_v0 }
 0x22f   : > { %v1778_v7 = vadd.f32 0.18741608, %v1777_v63  ;;  %v2227_v24 = vadd.f32 1.0, %v2502_v11  ;;  %v1714_v40 = vsub.f32 1.0, %v1713_v57  ;;  %vm1718_vm1 = vweird.f32 %v2626_v53  ;;  %v4001_v57 = vld [vmem:[#allocation6] ss:$0 sm:$0xff] }
 0x230   : > { %v1824_v19 = vmul.f32 %v1823_v28, %v3903_v8  ;;  %v1740_v6 = vadd.f32 1.1283791, %v1739_v20  ;;  %v3941_v29 = vadd.f32 1.0, %v1750_v25  ;;  %v1789_v35 = vadd.f32 0.4994258, %v1788_v18  ;;  %vm3947_vm2 = vmor %vm1717_vm0, %vm1718_vm1  ;;  %v786_v20 = vld [vmem:[#allocation7 + $0xd0] sm:$0xff] }
 0x231   : > { %v1815_v14 = vmul.f32 %v1814_v43, %v3903_v8  ;;  %v2259_v41 = vmul.f32 %v2227_v24, %v3829_v13  ;;  %v1715_v37 = vmul.f32 %v2626_v53, %v1714_v40  ;;  %v1779_v21 = vmul.f32 %v1778_v7, %v3874_v60  ;;  %v787_v25 = vld [vmem:[#allocation7 + $0x10] sm:$0xff] }
 0x232   : > { %v1825_v47 = vadd.f32 0.014752088, %v1824_v19  ;;  %vm3951_vm3 = vcmp.eq.f32.partialorder %v1721_v56, 8.507059e+37  ;;  %v1724_v44 = vor.u32 1.1754944e-38, %v1723_v39  ;;  %2627 = vrcp.f32 %v3941_v29 }
 0x233   : > { %v3957_v33 = vmul.f32 0.5, %v3835_v55  ;;  %2291 = vst [vmem:[#allocation8 + $0x90] sm:$0xff] %v2259_v41  ;;  %v1716_v13 = vadd.f32 %v2626_v53, %v1715_v37  ;;  %v1761_v31 = vand.u32 2147483647, %v3941_v29  ;;  %v1790_v48 = vmul.f32 %v1789_v35, %v3874_v60 }
 0x234   : > { %v1816_v42 = vadd.f32 0.05243302, %v1815_v14  ;;  %v3962_v30 = vmul.f32 %v1740_v6, %v3849_v58  ;;  %v1763_v50 = vand.u32 2147483648, %v3941_v29  ;;  %v1826_v17 = vmul.f32 %v1825_v47, %v3903_v8 }
 0x235   : > { %v820_v27 = vmul.f32 %v3507_v61, %v784_v1  ;;  %v1720_v55 = vsel %vm3947_vm2, %v2626_v53, %v1716_v13  ;;  %v1780_v32 = vadd.f32 1.1283791, %v1779_v21  ;;  %v3969_v22 = vadd.f32 1.0, %v1790_v48 }
 0x236   : > { %v1817_v49 = vmul.f32 %v1816_v42, %v3903_v8  ;;  %v1725_v60 = vsel %vm3951_vm3, %v1724_v44, %v1720_v55  ;;  %vm1757_vm4 = vweird.f32 %v3941_v29  ;;  %v1827_v58 = vadd.f32 0.112945676, %v1826_v17 }
 0x237   : > { %v3976_v10 = vadd.f32 %v3532_v9, %v820_v27  ;;  %v1726_v61 = vmul.f32 %v1725_v60, %v3921_v16  ;;  %vm3979_vm5 = vcmp.eq.f32.partialorder %v1761_v31, 8.507059e+37  ;;  %2629 = vrcp.f32 %v3969_v22 }
 0x238   : > { %v1801_v45 = vand.u32 2147483647, %v3969_v22  ;;  %v821_v51 = vmul.f32 %v3985_v3, %v785_v23  ;;  %v2628_v36 = vpop.eup %2627  ;;  %v1803_v5 = vand.u32 2147483648, %v3969_v22  ;;  %v1818_v34 = vadd.f32 0.18741608, %v1817_v49 }
 0x239   : > { %v1828_v9 = vmul.f32 %v1827_v58, %v3903_v8  ;;  %v3991_v16 = vmul.f32 0.70710677, %v3976_v10  ;;  %v2503_v38 = vclamps-f32 %v1726_v61, 1.0  ;;  %v1753_v46 = vmul.f32 %v2628_v36, %v3941_v29 }
 0x23a   : > { %v1764_v15 = vor.u32 1.1754944e-38, %v1763_v50  ;;  %v3995_v53 = vmul.f32 %v1780_v32, %v3852_v59  ;;  %vm1758_vm6 = vweird.f32 %v2628_v36  ;;  %vm1797_vm7 = vweird.f32 %v3969_v22  ;;  %v788_v59 = vld [vmem:[#allocation7 + $0x28] sm:$0xff] }
 0x23b   : > { %v1819_v56 = vmul.f32 %v1818_v34, %v3903_v8  ;;  %v1829_v63 = vadd.f32 0.4994258, %v1828_v9  ;;  %v2228_v0 = vadd.f32 1.0, %v2503_v38  ;;  %v1754_v28 = vsub.f32 1.0, %v1753_v46  ;;  %vm4020_vm9 = vmor %vm1757_vm4, %vm1758_vm6 }
 0x23c   : > { %v1849_v11 = vmul.f32 %v3991_v16, %v3991_v16  ;;  %v4004_v39 = vadd.f32 %v4001_v57, %v821_v51  ;;  %vm4006_vm8 = vcmp.eq.f32.partialorder %v1801_v45, 8.507059e+37  ;;  %v1804_v7 = vor.u32 1.1754944e-38, %v1803_v5 }
 0x23d   : > { %v1820_v18 = vadd.f32 1.1283791, %v1819_v56  ;;  %v1830_v43 = vmul.f32 %v1829_v63, %v3903_v8  ;;  %v2630_v24 = vpop.eup %2629  ;;  %v2260_v40 = vmul.f32 %v2228_v0, %v3864_v12  ;;  %v1755_v19 = vmul.f32 %v2628_v36, %v1754_v28 }
 0x23e   : > { %v4012_v6 = vmin.f32 %v1849_v11, 16.0  ;;  %v4015_v35 = vmul.f32 0.70710677, %v4004_v39  ;;  %v1793_v41 = vmul.f32 %v2630_v24, %v3969_v22  ;;  %v822_v8 = vmul.f32 %v3985_v3, %v786_v20 }
 0x23f   : > { %v1831_v37 = vadd.f32 1.0, %v1830_v43  ;;  %v4027_v12 = vmul.f32 %v3985_v3, %v787_v25  ;;  %2292 = vst [vmem:[#allocation8 + $0x98] sm:$0xff] %v2260_v40  ;;  %v1756_v21 = vadd.f32 %v2628_v36, %v1755_v19  ;;  %vm1798_vm10 = vweird.f32 %v2630_v24 }
 0x240   : > { %v1851_v47 = vmul.f32 2.1237322e-06, %v4012_v6  ;;  %v1862_v1 = vmul.f32 3.8918573e-05, %v4012_v6  ;;  %v1889_v29 = vmul.f32 %v4015_v35, %v4015_v35  ;;  %v1794_v4 = vsub.f32 1.0, %v1793_v41  ;;  %vm4045_vm12 = vmor %vm1797_vm7, %vm1798_vm10 }
 0x241   : > { %v4034_v26 = vmul.f32 %v1820_v18, %v3872_v54  ;;  %2631 = vrcp.f32 %v1831_v37  ;;  %v1760_v44 = vsel %vm4020_vm9, %v2628_v36, %v1756_v21  ;;  %v1841_v13 = vand.u32 2147483647, %v1831_v37 }
 0x242   : > { %v1852_v31 = vadd.f32 0.00028619796, %v1851_v47  ;;  %v1863_v48 = vadd.f32 0.001143296, %v1862_v1  ;;  %v1765_v42 = vsel %vm3979_vm5, %v1764_v15, %v1760_v44  ;;  %v1795_v50 = vmul.f32 %v2630_v24, %v1794_v4 }
 0x243   : > { %vm1837_vm11 = vweird.f32 %v1831_v37  ;;  %v4040_v17 = vmin.f32 %v1889_v29, 16.0  ;;  %v1766_v27 = vmul.f32 %v1765_v42, %v3962_v30  ;;  %v1843_v23 = vand.u32 2147483648, %v1831_v37 }
 0x244   : > { %v1853_v55 = vmul.f32 %v1852_v31, %v4012_v6  ;;  %v1864_v32 = vmul.f32 %v1863_v48, %v4012_v6  ;;  %v1796_v49 = vadd.f32 %v2630_v24, %v1795_v50  ;;  %v4054_v61 = vadd.f32 %v4001_v57, %v822_v8 }
 0x245   : > { %v1891_v60 = vmul.f32 2.1237322e-06, %v4040_v17  ;;  %v1902_v58 = vmul.f32 3.8918573e-05, %v4040_v17  ;;  %v2504_v30 = vclamps-f32 %v1766_v27, 1.0  ;;  %vm4056_vm13 = vcmp.eq.f32.partialorder %v1841_v13, 8.507059e+37 }
 0x246   : > { %v1854_v62 = vadd.f32 0.0036580483, %v1853_v55  ;;  %v1865_v45 = vadd.f32 0.014752088, %v1864_v32  ;;  %v1800_v36 = vsel %vm4045_vm12, %v2630_v24, %v1796_v49  ;;  %v4063_v9 = vmul.f32 0.70710677, %v4054_v61 }
 0x247   : > { %v2632_v51 = vpop.eup %2631  ;;  %v1892_v5 = vadd.f32 0.00028619796, %v1891_v60  ;;  %v1903_v34 = vadd.f32 0.001143296, %v1902_v58  ;;  %v2229_v38 = vadd.f32 1.0, %v2504_v30  ;;  %v1805_v46 = vsel %vm4006_vm8, %v1804_v7, %v1800_v36 }
 0x248   : > { %v1833_v15 = vmul.f32 %v2632_v51, %v1831_v37  ;;  %vm1838_vm14 = vweird.f32 %v2632_v51  ;;  %v1806_v56 = vmul.f32 %v1805_v46, %v3995_v53  ;;  %v1855_v63 = vmul.f32 %v1854_v62, %v4012_v6 }
 0x249   : > { %v1866_v0 = vmul.f32 %v1865_v45, %v4012_v6  ;;  %v1893_v28 = vmul.f32 %v1892_v5, %v4040_v17  ;;  %v2261_v11 = vmul.f32 %v2229_v38, %v3924_v52  ;;  %v1904_v25 = vmul.f32 %v1903_v34, %v4040_v17  ;;  %vm4079_vm15 = vmor %vm1837_vm11, %vm1838_vm14 }
 0x24a   : > { %v1834_v20 = vsub.f32 1.0, %v1833_v15  ;;  %v1929_v18 = vmul.f32 %v4063_v9, %v4063_v9  ;;  %v2505_v7 = vclamps-f32 %v1806_v56, 1.0  ;;  %v1844_v43 = vor.u32 1.1754944e-38, %v1843_v23 }
 0x24b   : > { %v1856_v24 = vadd.f32 0.05243302, %v1855_v63  ;;  %v1867_v40 = vadd.f32 0.112945676, %v1866_v0  ;;  %2293 = vst [vmem:[#allocation8 + $0xa0] sm:$0xff] %v2261_v11  ;;  %v824_v1 = vmul.f32 %v3985_v3, %v788_v59  ;;  %v887_v36 = vmul.f32 0.5, %v3856_v2 }
 0x24c   : > { %v1835_v53 = vmul.f32 %v2632_v51, %v1834_v20  ;;  %v1894_v19 = vadd.f32 0.0036580483, %v1893_v28  ;;  %v1905_v14 = vadd.f32 0.014752088, %v1904_v25  ;;  %v4075_v41 = vmin.f32 %v1929_v18, 16.0  ;;  %v789_v59 = vld [vmem:[#allocation7 + $0xa0] sm:$0xff] }
 0x24d   : > { %v2230_v8 = vadd.f32 1.0, %v2505_v7  ;;  %v1857_v21 = vmul.f32 %v1856_v24, %v4012_v6  ;;  %v1868_v47 = vmul.f32 %v1867_v40, %v4012_v6  ;;  %v4113_v2 = vmul.f32 0.5, %v3976_v10 }
 0x24e   : > { %v1836_v29 = vadd.f32 %v2632_v51, %v1835_v53  ;;  %v1895_v4 = vmul.f32 %v1894_v19, %v4040_v17  ;;  %v1906_v44 = vmul.f32 %v1905_v14, %v4040_v17  ;;  %v1931_v13 = vmul.f32 2.1237322e-06, %v4075_v41 }
 0x24f   : > { %v2262_v31 = vmul.f32 %v2230_v8, %v3957_v33  ;;  %v1858_v37 = vadd.f32 0.18741608, %v1857_v21  ;;  %v1869_v48 = vadd.f32 0.4994258, %v1868_v47  ;;  %v1942_v42 = vmul.f32 3.8918573e-05, %v4075_v41 }
 0x250   : > { %v1840_v50 = vsel %vm4079_vm15, %v2632_v51, %v1836_v29  ;;  %v1896_v27 = vadd.f32 0.05243302, %v1895_v4  ;;  %v1907_v54 = vadd.f32 0.112945676, %v1906_v44  ;;  %v1932_v23 = vadd.f32 0.00028619796, %v1931_v13 }
 0x251   : > { %2294 = vst [vmem:[#allocation8 + $0xa8] sm:$0xff] %v2262_v31  ;;  %v1845_v55 = vsel %vm4056_vm13, %v1844_v43, %v1840_v50  ;;  %v1859_v32 = vmul.f32 %v1858_v37, %v4012_v6  ;;  %v1870_v49 = vmul.f32 %v1869_v48, %v4012_v6  ;;  %v1943_v60 = vadd.f32 0.001143296, %v1942_v42 }
 0x252   : > { %v1846_v33 = vmul.f32 %v1845_v55, %v4034_v26  ;;  %v1897_v58 = vmul.f32 %v1896_v27, %v4040_v17  ;;  %v1908_v30 = vmul.f32 %v1907_v54, %v4040_v17  ;;  %v1933_v45 = vmul.f32 %v1932_v23, %v4075_v41 }
 0x253   : > { %v1871_v62 = vadd.f32 1.0, %v1870_v49  ;;  %v1944_v51 = vmul.f32 %v1943_v60, %v4075_v41  ;;  %v1860_v38 = vadd.f32 1.1283791, %v1859_v32  ;;  %v4105_v6 = vadd.f32 %v4001_v57, %v4027_v12 }
 0x254   : > { %v2506_v22 = vclamps-f32 %v1846_v33, 1.0  ;;  %v1898_v5 = vadd.f32 0.18741608, %v1897_v58  ;;  %v1909_v34 = vadd.f32 0.4994258, %v1908_v30  ;;  %v4108_v26 = vadd.f32 %v4001_v57, %v824_v1  ;;  %v790_v58 = vld [vmem:[#allocation7 + $0xf8] sm:$0xff] }
 0x255   : > { %2633 = vrcp.f32 %v1871_v62  ;;  %v1881_v15 = vand.u32 2147483647, %v1871_v62  ;;  %v4116_v0 = vmul.f32 0.5, %v4004_v39  ;;  %v1934_v28 = vadd.f32 0.0036580483, %v1933_v45 }
 0x256   : > { %v2231_v46 = vadd.f32 1.0, %v2506_v22  ;;  %v1899_v56 = vmul.f32 %v1898_v5, %v4040_v17  ;;  %v1910_v63 = vmul.f32 %v1909_v34, %v4040_v17  ;;  %v1945_v11 = vadd.f32 0.014752088, %v1944_v51 }
 0x257   : > { %v1883_v12 = vand.u32 2147483648, %v1871_v62  ;;  %v1935_v7 = vmul.f32 %v1934_v28, %v4075_v41  ;;  %v4121_v24 = vmul.f32 0.70710677, %v4105_v6  ;;  %v4124_v10 = vmul.f32 0.70710677, %v4108_v26 }
 0x258   : > { %v2263_v20 = vmul.f32 %v2231_v46, %v887_v36  ;;  %v1900_v25 = vadd.f32 1.1283791, %v1899_v56  ;;  %v1911_v18 = vadd.f32 1.0, %v1910_v63  ;;  %v1946_v43 = vmul.f32 %v1945_v11, %v4075_v41 }
 0x259   : > { %v1861_v39 = vmul.f32 %v1860_v38, %v3991_v16  ;;  %vm1877_vm0 = vweird.f32 %v1871_v62  ;;  %vm4127_vm1 = vcmp.eq.f32.partialorder %v1881_v15, 8.507059e+37  ;;  %v1936_v19 = vadd.f32 0.05243302, %v1935_v7 }
 0x25a   : > { %2295 = vst [vmem:[#allocation8 + $0xb0] sm:$0xff] %v2263_v20  ;;  %2635 = vrcp.f32 %v1911_v18  ;;  %v1921_v53 = vand.u32 2147483647, %v1911_v18  ;;  %v1947_v14 = vadd.f32 0.112945676, %v1946_v43  ;;  %v825_v8 = vmul.f32 %v3985_v3, %v789_v59 }
 0x25b   : > { %v2634_v40 = vpop.eup %2633  ;;  %v1884_v21 = vor.u32 1.1754944e-38, %v1883_v12  ;;  %v4133_v47 = vmul.f32 %v1900_v25, %v4015_v35  ;;  %v1969_v16 = vmul.f32 %v4121_v24, %v4121_v24  ;;  %vm1917_vm2 = vweird.f32 %v1911_v18 }
 0x25c   : > { %v1873_v52 = vmul.f32 %v2634_v40, %v1871_v62  ;;  %v1937_v1 = vmul.f32 %v1936_v19, %v4075_v41  ;;  %v1948_v29 = vmul.f32 %v1947_v14, %v4075_v41  ;;  %v2009_v4 = vmul.f32 %v4124_v10, %v4124_v10 }
 0x25d   : > { %vm1878_vm3 = vweird.f32 %v2634_v40  ;;  %v1923_v13 = vand.u32 2147483648, %v1911_v18  ;;  %v4141_v31 = vmin.f32 %v1969_v16, 16.0  ;;  %vm4143_vm4 = vcmp.eq.f32.partialorder %v1921_v53, 8.507059e+37 }
 0x25e   : > { %v1874_v44 = vsub.f32 1.0, %v1873_v52  ;;  %v1938_v35 = vadd.f32 0.18741608, %v1937_v1  ;;  %v1949_v48 = vadd.f32 0.4994258, %v1948_v29  ;;  %v4147_v42 = vmin.f32 %v2009_v4, 16.0  ;;  %vm4155_vm5 = vmor %vm1877_vm0, %vm1878_vm3 }
 0x25f   : > { %v1971_v54 = vmul.f32 2.1237322e-06, %v4141_v31  ;;  %v1982_v23 = vmul.f32 3.8918573e-05, %v4141_v31  ;;  %v4152_v55 = vadd.f32 %v4001_v57, %v825_v8  ;;  %v1924_v28 = vor.u32 1.1754944e-38, %v1923_v13 }
 0x260   : > { %v2636_v50 = vpop.eup %2635  ;;  %v1875_v27 = vmul.f32 %v2634_v40, %v1874_v44  ;;  %v1939_v60 = vmul.f32 %v1938_v35, %v4075_v41  ;;  %v1950_v33 = vmul.f32 %v1949_v48, %v4075_v41  ;;  %v2011_v36 = vmul.f32 2.1237322e-06, %v4147_v42 }
 0x261   : > { %v1913_v49 = vmul.f32 %v2636_v50, %v1911_v18  ;;  %vm1918_vm6 = vweird.f32 %v2636_v50  ;;  %v1972_v45 = vadd.f32 0.00028619796, %v1971_v54  ;;  %v1983_v51 = vadd.f32 0.001143296, %v1982_v23 }
 0x262   : > { %v1876_v30 = vadd.f32 %v2634_v40, %v1875_v27  ;;  %v1940_v5 = vadd.f32 1.1283791, %v1939_v60  ;;  %v1951_v34 = vadd.f32 1.0, %v1950_v33  ;;  %v2022_v62 = vmul.f32 3.8918573e-05, %v4147_v42  ;;  %vm4171_vm7 = vmor %vm1917_vm2, %vm1918_vm6 }
 0x263   : > { %v1914_v22 = vsub.f32 1.0, %v1913_v49  ;;  %v1973_v46 = vmul.f32 %v1972_v45, %v4141_v31  ;;  %v1984_v15 = vmul.f32 %v1983_v51, %v4141_v31  ;;  %v2012_v56 = vadd.f32 0.00028619796, %v2011_v36 }
 0x264   : > { %v1880_v38 = vsel %vm4155_vm5, %v2634_v40, %v1876_v30  ;;  %2637 = vrcp.f32 %v1951_v34  ;;  %v4176_v12 = vmul.f32 %v1940_v5, %v4063_v9  ;;  %v4179_v25 = vmul.f32 0.70710677, %v4152_v55 }
 0x265   : > { %v1885_v41 = vsel %vm4127_vm1, %v1884_v21, %v1880_v38  ;;  %v1915_v63 = vmul.f32 %v2636_v50, %v1914_v22  ;;  %v826_v59 = vmul.f32 %v3985_v3, %v790_v58  ;;  %v1974_v43 = vadd.f32 0.0036580483, %v1973_v46 }
 0x266   : > { %v1886_v11 = vmul.f32 %v1885_v41, %v1861_v39  ;;  %v1985_v17 = vadd.f32 0.014752088, %v1984_v15  ;;  %v2013_v40 = vmul.f32 %v2012_v56, %v4147_v42  ;;  %vm1957_vm8 = vweird.f32 %v1951_v34 }
 0x267   : > { %v1916_v7 = vadd.f32 %v2636_v50, %v1915_v63  ;;  %v1961_v18 = vand.u32 2147483647, %v1951_v34  ;;  %v2023_v53 = vadd.f32 0.001143296, %v2022_v62  ;;  %v1975_v9 = vmul.f32 %v1974_v43, %v4141_v31 }
 0x268   : > { %v2507_v39 = vclamps-f32 %v1886_v11, 1.0  ;;  %v1986_v14 = vmul.f32 %v1985_v17, %v4141_v31  ;;  %v2014_v8 = vadd.f32 0.0036580483, %v2013_v40  ;;  %v1963_v16 = vand.u32 2147483648, %v1951_v34  ;;  %v791_v40 = vld [vmem:[#allocation7 + $0x20] sm:$0xff] }
 0x269   : > { %v1920_v19 = vsel %vm4171_vm7, %v2636_v50, %v1916_v7  ;;  %v2024_v1 = vmul.f32 %v2023_v53, %v4147_v42  ;;  %v1976_v44 = vadd.f32 0.05243302, %v1975_v9  ;;  %vm4193_vm9 = vcmp.eq.f32.partialorder %v1961_v18, 8.507059e+37 }
 0x26a   : > { %v2232_v52 = vadd.f32 1.0, %v2507_v39  ;;  %v1925_v21 = vsel %vm4143_vm4, %v1924_v28, %v1920_v19  ;;  %v2638_v29 = vpop.eup %2637  ;;  %v1987_v13 = vadd.f32 0.112945676, %v1986_v14  ;;  %v2015_v35 = vmul.f32 %v2014_v8, %v4147_v42  ;;  %v792_v8 = vld [vmem:[#allocation7 + $0x98] sm:$0xff] }
 0x26b   : > { %v1926_v4 = vmul.f32 %v1925_v21, %v4133_v47  ;;  %v1953_v50 = vmul.f32 %v2638_v29, %v1951_v34  ;;  %v2025_v54 = vadd.f32 0.014752088, %v2024_v1  ;;  %v1977_v23 = vmul.f32 %v1976_v44, %v4141_v31 }
 0x26c   : > { %v2264_v48 = vmul.f32 %v2232_v52, %v4113_v2  ;;  %v1988_v32 = vmul.f32 %v1987_v13, %v4141_v31  ;;  %v2016_v49 = vadd.f32 0.05243302, %v2015_v35  ;;  %vm1958_vm10 = vweird.f32 %v2638_v29 }
 0x26d   : > { %v2508_v37 = vclamps-f32 %v1926_v4, 1.0  ;;  %v1954_v47 = vsub.f32 1.0, %v1953_v50  ;;  %v2026_v60 = vmul.f32 %v2025_v54, %v4147_v42  ;;  %v2049_v2 = vmul.f32 %v4179_v25, %v4179_v25  ;;  %vm4209_vm11 = vmor %vm1957_vm8, %vm1958_vm10 }
 0x26e   : > { %2296 = vst [vmem:[#allocation8 + $0xb8] sm:$0xff] %v2264_v48  ;;  %v1978_v58 = vadd.f32 0.18741608, %v1977_v23  ;;  %v1989_v30 = vadd.f32 0.4994258, %v1988_v32  ;;  %v4203_v45 = vadd.f32 %v4001_v57, %v826_v59  ;;  %v1964_v36 = vor.u32 1.1754944e-38, %v1963_v16 }
 0x26f   : > { %v2233_v33 = vadd.f32 1.0, %v2508_v37  ;;  %v1955_v51 = vmul.f32 %v2638_v29, %v1954_v47  ;;  %v2027_v22 = vadd.f32 0.112945676, %v2026_v60  ;;  %v4205_v5 = vmin.f32 %v2049_v2, 16.0 }
 0x270   : > { %v1979_v46 = vmul.f32 %v1978_v58, %v4141_v31  ;;  %v1990_v15 = vmul.f32 %v1989_v30, %v4141_v31  ;;  %v2017_v56 = vmul.f32 %v2016_v49, %v4147_v42  ;;  %v4220_v34 = vmul.f32 0.70710677, %v4203_v45 }
 0x271   : > { %v2265_v62 = vmul.f32 %v2233_v33, %v4116_v0  ;;  %v1956_v41 = vadd.f32 %v2638_v29, %v1955_v51  ;;  %v2028_v63 = vmul.f32 %v2027_v22, %v4147_v42  ;;  %v2051_v28 = vmul.f32 2.1237322e-06, %v4205_v5 }
 0x272   : > { %v2062_v11 = vmul.f32 3.8918573e-05, %v4205_v5  ;;  %v1991_v0 = vadd.f32 1.0, %v1990_v15  ;;  %v2018_v17 = vadd.f32 0.18741608, %v2017_v56  ;;  %v2089_v14 = vmul.f32 %v4220_v34, %v4220_v34 }
 0x273   : > { %2297 = vst [vmem:[#allocation8 + $0xc0] sm:$0xff] %v2265_v62  ;;  %v1960_v20 = vsel %vm4209_vm11, %v2638_v29, %v1956_v41  ;;  %v2029_v59 = vadd.f32 0.4994258, %v2028_v63  ;;  %v2052_v7 = vadd.f32 0.00028619796, %v2051_v28  ;;  %v890_v52 = vmul.f32 0.5, %v4054_v61 }
 0x274   : > { %v2063_v31 = vadd.f32 0.001143296, %v2062_v11  ;;  %v1965_v43 = vsel %vm4193_vm9, %v1964_v36, %v1960_v20  ;;  %2639 = vrcp.f32 %v1991_v0  ;;  %v1980_v18 = vadd.f32 1.1283791, %v1979_v46 }
 0x275   : > { %v1966_v39 = vmul.f32 %v1965_v43, %v4176_v12  ;;  %v2030_v53 = vmul.f32 %v2029_v59, %v4147_v42  ;;  %v2053_v19 = vmul.f32 %v2052_v7, %v4205_v5  ;;  %v4234_v16 = vmul.f32 0.5, %v4105_v6 }
 0x276   : > { %v2064_v9 = vmul.f32 %v2063_v31, %v4205_v5  ;;  %v827_v1 = vmul.f32 %v3985_v3, %v791_v40  ;;  %v2019_v12 = vmul.f32 %v2018_v17, %v4147_v42  ;;  %v1981_v35 = vmul.f32 %v1980_v18, %v4121_v24 }
 0x277   : > { %v2509_v21 = vclamps-f32 %v1966_v39, 1.0  ;;  %v4238_v29 = vadd.f32 1.0, %v2030_v53  ;;  %v2054_v4 = vadd.f32 0.0036580483, %v2053_v19  ;;  %v4241_v48 = vmin.f32 %v2089_v14, 16.0 }
 0x278   : > { %v2065_v44 = vadd.f32 0.014752088, %v2064_v9  ;;  %v828_v50 = vmul.f32 %v3985_v3, %v792_v8  ;;  %vm1997_vm12 = vweird.f32 %v1991_v0  ;;  %v2001_v27 = vand.u32 2147483647, %v1991_v0 }
 0x279   : > { %v2234_v13 = vadd.f32 1.0, %v2509_v21  ;;  %v2003_v6 = vand.u32 2147483648, %v1991_v0  ;;  %2641 = vrcp.f32 %v4238_v29  ;;  %v2055_v42 = vmul.f32 %v2054_v4, %v4205_v5 }
 0x27a   : > { %v2640_v61 = vpop.eup %2639  ;;  %v4247_v23 = vadd.f32 %v4001_v57, %v827_v1  ;;  %v2020_v32 = vadd.f32 1.1283791, %v2019_v12  ;;  %v2066_v24 = vmul.f32 %v2065_v44, %v4205_v5  ;;  %v2091_v49 = vmul.f32 2.1237322e-06, %v4241_v48 }
 0x27b   : > { %v2266_v54 = vmul.f32 %v2234_v13, %v890_v52  ;;  %v1993_v37 = vmul.f32 %v2640_v61, %v1991_v0  ;;  %vm1998_vm13 = vweird.f32 %v2640_v61  ;;  %v2056_v47 = vadd.f32 0.05243302, %v2055_v42 }
 0x27c   : > { %v2102_v60 = vmul.f32 3.8918573e-05, %v4241_v48  ;;  %v4253_v2 = vadd.f32 %v4001_v57, %v828_v50  ;;  %vm4255_vm14 = vcmp.eq.f32.partialorder %v2001_v27, 8.507059e+37  ;;  %v2004_v58 = vor.u32 1.1754944e-38, %v2003_v6  ;;  %vm4265_vm15 = vmor %vm1997_vm12, %vm1998_vm13 }
 0x27d   : > { %2298 = vst [vmem:[#allocation8 + $0xc8] sm:$0xff] %v2266_v54  ;;  %v1994_v3 = vsub.f32 1.0, %v1993_v37  ;;  %v2067_v30 = vadd.f32 0.112945676, %v2066_v24  ;;  %v2092_v51 = vadd.f32 0.00028619796, %v2091_v49  ;;  %v2057_v22 = vmul.f32 %v2056_v47, %v4205_v5 }
 0x27e   : > { %v2103_v62 = vadd.f32 0.001143296, %v2102_v60  ;;  %v4261_v38 = vmul.f32 0.70710677, %v4247_v23  ;;  %vm2037_vm0 = vweird.f32 %v4238_v29  ;;  %v2041_v15 = vand.u32 2147483647, %v4238_v29 }
 0x27f   : > { %v1995_v36 = vmul.f32 %v2640_v61, %v1994_v3  ;;  %v2642_v46 = vpop.eup %2641  ;;  %v2068_v56 = vmul.f32 %v2067_v30, %v4205_v5  ;;  %v2093_v41 = vmul.f32 %v2092_v51, %v4241_v48  ;;  %v2043_v11 = vand.u32 2147483648, %v4238_v29 }
 0x280   : > { %v2033_v28 = vmul.f32 %v2642_v46, %v4238_v29  ;;  %v4276_v20 = vmul.f32 0.70710677, %v4253_v2  ;;  %v2058_v0 = vadd.f32 0.18741608, %v2057_v22  ;;  %v2104_v7 = vmul.f32 %v2103_v62, %v4241_v48 }
 0x281   : > { %v1996_v63 = vadd.f32 %v2640_v61, %v1995_v36  ;;  %v2069_v59 = vadd.f32 0.4994258, %v2068_v56  ;;  %v2129_v31 = vmul.f32 %v4261_v38, %v4261_v38  ;;  %vm2038_vm1 = vweird.f32 %v2642_v46 }
 0x282   : > { %v2034_v17 = vsub.f32 1.0, %v2033_v28  ;;  %v2094_v40 = vadd.f32 0.0036580483, %v2093_v41  ;;  %v2021_v18 = vmul.f32 %v2020_v32, %v4124_v10  ;;  %v2105_v19 = vadd.f32 0.014752088, %v2104_v7  ;;  %vm4291_vm2 = vmor %vm2037_vm0, %vm2038_vm1 }
 0x283   : > { %v2000_v43 = vsel %vm4265_vm15, %v2640_v61, %v1996_v63  ;;  %v2070_v53 = vmul.f32 %v2069_v59, %v4205_v5  ;;  %v2044_v8 = vor.u32 1.1754944e-38, %v2043_v11  ;;  %v2169_v52 = vmul.f32 %v4276_v20, %v4276_v20 }
 0x284   : > { %v2005_v39 = vsel %vm4255_vm14, %v2004_v58, %v2000_v43  ;;  %v2035_v14 = vmul.f32 %v2642_v46, %v2034_v17  ;;  %v2059_v1 = vmul.f32 %v2058_v0, %v4205_v5  ;;  %v2106_v10 = vmul.f32 %v2105_v19, %v4241_v48 }
 0x285   : > { %v2006_v9 = vmul.f32 %v2005_v39, %v1981_v35  ;;  %v2071_v12 = vadd.f32 1.0, %v2070_v53  ;;  %v4297_v4 = vmin.f32 %v2129_v31, 16.0  ;;  %vm2042_vm3 = vcmp.eq.f32.partialorder %v2041_v15, 8.507059e+37 }
 0x286   : > { %v2036_v13 = vadd.f32 %v2642_v46, %v2035_v14  ;;  %v2095_v35 = vmul.f32 %v2094_v40, %v4241_v48  ;;  %v2107_v27 = vadd.f32 0.112945676, %v2106_v10  ;;  %v4303_v6 = vmin.f32 %v2169_v52, 16.0 }
 0x287   : > { %v2510_v44 = vclamps-f32 %v2006_v9, 1.0  ;;  %2643 = vrcp.f32 %v2071_v12  ;;  %v2131_v50 = vmul.f32 2.1237322e-06, %v4297_v4  ;;  %v892_v5 = vmul.f32 0.5, %v4108_v26 }
 0x288   : > { %v2040_v61 = vsel %vm4291_vm2, %v2642_v46, %v2036_v13  ;;  %v2060_v37 = vadd.f32 1.1283791, %v2059_v1  ;;  %v2096_v24 = vadd.f32 0.05243302, %v2095_v35  ;;  %v2108_v49 = vmul.f32 %v2107_v27, %v4241_v48 }
 0x289   : > { %v2235_v29 = vadd.f32 1.0, %v2510_v44  ;;  %v2045_v54 = vsel %vm2042_vm3, %v2044_v8, %v2040_v61  ;;  %v2132_v3 = vadd.f32 0.00028619796, %v2131_v50  ;;  %v2142_v47 = vmul.f32 3.8918573e-05, %v4297_v4 }
 0x28a   : > { %v2046_v32 = vmul.f32 %v2045_v54, %v2021_v18  ;;  %v2171_v60 = vmul.f32 2.1237322e-06, %v4303_v6  ;;  %v2109_v58 = vadd.f32 0.4994258, %v2108_v49  ;;  %v2182_v30 = vmul.f32 3.8918573e-05, %v4303_v6 }
 0x28b   : > { %v2267_v42 = vmul.f32 %v2235_v29, %v4234_v16  ;;  %vm2077_vm4 = vweird.f32 %v2071_v12  ;;  %v2133_v26 = vmul.f32 %v2132_v3, %v4297_v4  ;;  %v2143_v36 = vadd.f32 0.001143296, %v2142_v47 }
 0x28c   : > { %v2511_v33 = vclamps-f32 %v2046_v32, 1.0  ;;  %v2172_v16 = vadd.f32 0.00028619796, %v2171_v60  ;;  %v2081_v46 = vand.u32 2147483647, %v2071_v12  ;;  %v2097_v57 = vmul.f32 %v2096_v24, %v4241_v48 }
 0x28d   : > { %2299 = vst [vmem:[#allocation8 + $0xd0] sm:$0xff] %v2267_v42  ;;  %v2644_v51 = vpop.eup %2643  ;;  %v2083_v15 = vand.u32 2147483648, %v2071_v12  ;;  %v2110_v56 = vmul.f32 %v2109_v58, %v4241_v48  ;;  %v2144_v41 = vmul.f32 %v2143_v36, %v4297_v4  ;;  %v2183_v0 = vadd.f32 0.001143296, %v2182_v30 }
 0x28e   : > { %v2236_v22 = vadd.f32 1.0, %v2511_v33  ;;  %v2073_v62 = vmul.f32 %v2644_v51, %v2071_v12  ;;  %vm2078_vm5 = vweird.f32 %v2644_v51  ;;  %v2173_v11 = vmul.f32 %v2172_v16, %v4303_v6 }
 0x28f   : > { %v2111_v59 = vadd.f32 1.0, %v2110_v56  ;;  %v2134_v7 = vadd.f32 0.0036580483, %v2133_v26  ;;  %v2145_v31 = vadd.f32 0.014752088, %v2144_v41  ;;  %v2184_v40 = vmul.f32 %v2183_v0, %v4303_v6  ;;  %vm2079_vm6 = vmor %vm2077_vm4, %vm2078_vm5 }
 0x290   : > { %v2268_v63 = vmul.f32 %v2236_v22, %v892_v5  ;;  %v2074_v28 = vsub.f32 1.0, %v2073_v62  ;;  %v2098_v17 = vadd.f32 0.18741608, %v2097_v57  ;;  %v2061_v39 = vmul.f32 %v2060_v37, %v4179_v25 }
 0x291   : > { %v2084_v18 = vor.u32 1.1754944e-38, %v2083_v15  ;;  %2645 = vrcp.f32 %v2111_v59  ;;  %vm2082_vm7 = vcmp.eq.f32.partialorder %v2081_v46, 8.507059e+37  ;;  %v2146_v19 = vmul.f32 %v2145_v31, %v4297_v4 }
 0x292   : > { %2300 = vst [vmem:[#allocation8 + $0xd8] sm:$0xff] %v2268_v63  ;;  %v2075_v43 = vmul.f32 %v2644_v51, %v2074_v28  ;;  %v2174_v9 = vadd.f32 0.0036580483, %v2173_v11  ;;  %v2135_v14 = vmul.f32 %v2134_v7, %v4297_v4  ;;  %v2185_v8 = vadd.f32 0.014752088, %v2184_v40 }
 0x293   : > { %v2099_v21 = vmul.f32 %v2098_v17, %v4241_v48  ;;  %v2147_v1 = vadd.f32 0.112945676, %v2146_v19  ;;  %v893_v50 = vmul.f32 0.5, %v4152_v55  ;;  %vm2117_vm8 = vweird.f32 %v2111_v59 }
 0x294   : > { %v2076_v53 = vadd.f32 %v2644_v51, %v2075_v43  ;;  %v2186_v25 = vmul.f32 %v2185_v8, %v4303_v6  ;;  %v2175_v13 = vmul.f32 %v2174_v9, %v4303_v6  ;;  %v2136_v29 = vadd.f32 0.05243302, %v2135_v14 }
 0x295   : > { %v2148_v12 = vmul.f32 %v2147_v1, %v4297_v4  ;;  %v2100_v5 = vadd.f32 1.1283791, %v2099_v21  ;;  %v2121_v37 = vand.u32 2147483647, %v2111_v59  ;;  %v2123_v48 = vand.u32 2147483648, %v2111_v59 }
 0x296   : > { %v2080_v52 = vsel %vm2079_vm6, %v2644_v51, %v2076_v53  ;;  %v2187_v61 = vadd.f32 0.112945676, %v2186_v25  ;;  %v2176_v3 = vadd.f32 0.05243302, %v2175_v13  ;;  %v2137_v47 = vmul.f32 %v2136_v29, %v4297_v4 }
 0x297   : > { %v2085_v10 = vsel %vm2082_vm7, %v2084_v18, %v2080_v52  ;;  %v2646_v35 = vpop.eup %2645  ;;  %v2149_v42 = vadd.f32 0.4994258, %v2148_v12  ;;  %v2124_v30 = vor.u32 1.1754944e-38, %v2123_v48  ;;  %v2101_v36 = vmul.f32 %v2100_v5, %v4220_v34 }
 0x298   : > { %v2086_v44 = vmul.f32 %v2085_v10, %v2061_v39  ;;  %v2113_v54 = vmul.f32 %v2646_v35, %v2111_v59  ;;  %v2188_v32 = vmul.f32 %v2187_v61, %v4303_v6  ;;  %vm2118_vm9 = vweird.f32 %v2646_v35 }
 0x299   : > { %v2150_v60 = vmul.f32 %v2149_v42, %v4297_v4  ;;  %vm2119_vm10 = vmor %vm2117_vm8, %vm2118_vm9  ;;  %vm2122_vm11 = vcmp.eq.f32.partialorder %v2121_v37, 8.507059e+37  ;;  %v2177_v22 = vmul.f32 %v2176_v3, %v4303_v6  ;;  %v2138_v62 = vadd.f32 0.18741608, %v2137_v47 }
 0x29a   : > { %v2512_v27 = vclamps-f32 %v2086_v44, 1.0  ;;  %v2114_v49 = vsub.f32 1.0, %v2113_v54  ;;  %v2189_v55 = vadd.f32 0.4994258, %v2188_v32  ;;  %v894_v28 = vmul.f32 0.5, %v4203_v45 }
 0x29b   : > { %v2151_v51 = vadd.f32 1.0, %v2150_v60  ;;  %v2178_v41 = vadd.f32 0.18741608, %v2177_v22  ;;  %v2139_v63 = vmul.f32 %v2138_v62, %v4297_v4 }
 0x29c   : > { %v2237_v24 = vadd.f32 1.0, %v2512_v27  ;;  %v2115_v58 = vmul.f32 %v2646_v35, %v2114_v49  ;;  %v2190_v26 = vmul.f32 %v2189_v55, %v4303_v6 }
 0x29d   : > { %2647 = vrcp.f32 %v2151_v51  ;;  %v2163_v7 = vand.u32 2147483648, %v2151_v51  ;;  %v2179_v31 = vmul.f32 %v2178_v41, %v4303_v6  ;;  %v2140_v43 = vadd.f32 1.1283791, %v2139_v63 }
 0x29e   : > { %v2269_v33 = vmul.f32 %v2237_v24, %v893_v50  ;;  %v2116_v16 = vadd.f32 %v2646_v35, %v2115_v58  ;;  %v2191_v57 = vadd.f32 1.0, %v2190_v26  ;;  %vm2157_vm12 = vweird.f32 %v2151_v51 }
 0x29f   : > { %v2161_v18 = vand.u32 2147483647, %v2151_v51  ;;  %v2164_v4 = vor.u32 1.1754944e-38, %v2163_v7  ;;  %v2180_v9 = vadd.f32 1.1283791, %v2179_v31  ;;  %v2141_v6 = vmul.f32 %v2140_v43, %v4261_v38 }
 0x2a0   : > { %2301 = vst [vmem:[#allocation8 + $0xe0] sm:$0xff] %v2269_v33  ;;  %v2120_v46 = vsel %vm2119_vm10, %v2646_v35, %v2116_v16  ;;  %2649 = vrcp.f32 %v2191_v57  ;;  %v2203_v45 = vand.u32 2147483648, %v2191_v57  ;;  %vm2197_vm15 = vweird.f32 %v2191_v57 }
 0x2a1   : > { %v2125_v15 = vsel %vm2122_vm11, %v2124_v30, %v2120_v46  ;;  %v2201_v8 = vand.u32 2147483647, %v2191_v57  ;;  %vm2162_vm1 = vcmp.eq.f32.partialorder %v2161_v18, 8.507059e+37  ;;  %v2181_v44 = vmul.f32 %v2180_v9, %v4276_v20 }
 0x2a2   : > { %v2126_v56 = vmul.f32 %v2125_v15, %v2101_v36  ;;  %v2204_v10 = vor.u32 1.1754944e-38, %v2203_v45  ;;  %v895_v50 = vmul.f32 0.5, %v4247_v23  ;;  %v896_v38 = vmul.f32 0.5, %v4253_v2 }
 0x2a3   : > { %v2648_v0 = vpop.eup %2647  ;;  %vm2202_vm3 = vcmp.eq.f32.partialorder %v2201_v8, 8.507059e+37 }
 0x2a4   : > { %v2513_v11 = vclamps-f32 %v2126_v56, 1.0  ;;  %v2153_v34 = vmul.f32 %v2648_v0, %v2151_v51  ;;  %vm2158_vm13 = vweird.f32 %v2648_v0 }
 0x2a5   : > { %vm2159_vm14 = vmor %vm2157_vm12, %vm2158_vm13 }
 0x2a6   : > { %v2238_v59 = vadd.f32 1.0, %v2513_v11  ;;  %v2650_v17 = vpop.eup %2649  ;;  %v2154_v39 = vsub.f32 1.0, %v2153_v34 }
 0x2a7   : > { %v2193_v53 = vmul.f32 %v2650_v17, %v2191_v57  ;;  %vm2198_vm0 = vweird.f32 %v2650_v17 }
 0x2a8   : > { %v2270_v40 = vmul.f32 %v2238_v59, %v894_v28  ;;  %v2155_v19 = vmul.f32 %v2648_v0, %v2154_v39  ;;  %vm2199_vm2 = vmor %vm2197_vm15, %vm2198_vm0 }
 0x2a9   : > { %v2194_v14 = vsub.f32 1.0, %v2193_v53 }
 0x2aa   : > { %2302 = vst [vmem:[#allocation8 + $0xe8] sm:$0xff] %v2270_v40  ;;  %v2156_v52 = vadd.f32 %v2648_v0, %v2155_v19 }
 0x2ab   : > { %v2195_v21 = vmul.f32 %v2650_v17, %v2194_v14 }
 0x2ac   : > { %v2160_v1 = vsel %vm2159_vm14, %v2648_v0, %v2156_v52 }
 0x2ad   : > { %v2165_v25 = vsel %vm2162_vm1, %v2164_v4, %v2160_v1  ;;  %v2196_v12 = vadd.f32 %v2650_v17, %v2195_v21 }
 0x2ae   : > { %v2166_v13 = vmul.f32 %v2165_v25, %v2141_v6 }
 0x2af   : > { %v2200_v35 = vsel %vm2199_vm2, %v2650_v17, %v2196_v12 }
 0x2b0   : > { %v2514_v29 = vclamps-f32 %v2166_v13, 1.0  ;;  %v2205_v61 = vsel %vm2202_vm3, %v2204_v10, %v2200_v35 }
 0x2b1   : > { %v2206_v27 = vmul.f32 %v2205_v61, %v2181_v44 }
 0x2b2   : > { %v2239_v5 = vadd.f32 1.0, %v2514_v29 }
 0x2b3   : > { %v2515_v54 = vclamps-f32 %v2206_v27, 1.0 }
 0x2b4   : > { %v2271_v37 = vmul.f32 %v2239_v5, %v895_v50 }
 0x2b5   : > { %v2240_v48 = vadd.f32 1.0, %v2515_v54 }
 0x2b6   : > { %2303 = vst [vmem:[#allocation8 + $0xf0] sm:$0xff] %v2271_v37 }
 0x2b7   : > { %v2272_v42 = vmul.f32 %v2240_v48, %v896_v38 }
 0x2b9   : > { %2304 = vst [vmem:[#allocation8 + $0xf8] sm:$0xff] %v2272_v42 }
 0x2ba PF: > { %p2552_p6 = scmp.eq.s32.totalorder %s2441_s18, 1  ;;  %s2322_s26 = sshll.u32 %s4361_s4, 4  ;;  %s2323_s26 = int_to_ptr.hbm [resolvable:$true] %s2322_s26 }
 0x2bb   : > { %s2711_s27 = smov [#allocation8]   ;;  %s2712_s29 = smov 128  }
 0x2bc   : > { %s2320_s28 = sshll.u32 %s2711_s27, 4  ;;  %s2713_s30 = smov 8   ;;  %s2321_s28 = int_to_ptr.vmem [resolvable:$true] %s2320_s28 }
 0x2bd   : > { %2545 = dma.vmem_to_hbm [thread:$0]  (%p2552_p6), %s2321_s28, 4096, %s2323_s26, [#allocation9], %s2712_s29, %s2712_s29, %s2713_s30  }
 0x2be PF: > { %p2553_p7 = scmp.ge.s32.totalorder %s2709_s17, 2  ;;  %p2554_p8 = scmp.eq.s32.totalorder %s2442_s19, 1 }
 0x2c0   : > { %p2549_p9 = pnand %p2554_p8, %p2553_p7 }
 0x2c2   : > { %p2550_p10 = pneg %p2549_p9 }
 0x2c4   : > { %2696 = dma.done.wait (%p2550_p10), [#allocation9], 4096  }
 0x2c5   : > { %2698 = vsyncadd (%p2550_p10), [#allocation9], 4294963200  ;;  %s17_s17 = sadd.s32 1, %s2709_s17   ;;  %s4464_s15 = smov %s2705_s16 }
 0x2c6   : > { %p14_p11 = scmp.ge.s32.totalorder %s17_s17, 4   ;;  %s4465_s16 = smov %s4467_s20 }
 0x2c8   :  { %16 = sbr.rel (!%p14_p11) target bundleno = 3 (0x3), region = 98 }
 0x2cd   :  { %2344 = vsyncpa [#allocation9], 1 }
 0x2ce   :  { %2346 = vsyncpa [#allocation9 + $0x1], 1 }

</bundles_post_ra>
